<compile_context>
chip_gen: v7x
topology: tpu7x:2x2x1
jax: 0.10.0
libtpu: 0.0.40
codegen_flags: <defaults>
</compile_context>

<pallas_src>
import functools
import math

import jax
import jax.numpy as jnp
from jax.experimental import pallas as pl
from jax.experimental.pallas import tpu as pltpu


def _round_up(x: int, m: int) -> int:
    return ((x + m - 1) // m) * m


# --------------------------------------------------------------------------
# Kernels
# --------------------------------------------------------------------------

def _coupler_kernel_resident(prot_ref, gene_ref, w1_ref, b1_ref, w2_ref, b2_ref,
                             wg_ref, bg_ref, out_ref):
    """One batch tile. W1 (and all other weights) are VMEM-resident; the whole
    forward for this tile is a single grid step (1-D 'parallel' batch grid)."""
    C = prot_ref.shape[1]

    # In-kernel f32 -> bf16 cast (VPU, hidden under MXU/DMA); avoids a separate
    # XLA cast pass over the dominant gene_expr HBM stream.
    gene_bf = gene_ref[...].astype(w1_ref.dtype)
    h = jnp.dot(gene_bf, w1_ref[...], preferred_element_type=jnp.float32) + b1_ref[...]
    h = jnp.maximum(h, 0.0)

    gene_feat = jnp.dot(h.astype(w2_ref.dtype), w2_ref[...],
                        preferred_element_type=jnp.float32) + b2_ref[...]
    prot = prot_ref[...].astype(jnp.float32)

    # Gate: concat([prot, gene_feat]) @ Wg  ==  prot @ Wg[:C] + gene_feat @ Wg[C:]
    # (avoids materializing a (tb, 2C) concat temp; better on v5e's 128-deep MXU).
    wg = wg_ref[...]
    gate_logit = (jnp.dot(prot.astype(wg.dtype), wg[:C, :],
                          preferred_element_type=jnp.float32)
                  + jnp.dot(gene_feat.astype(wg.dtype), wg[C:, :],
                            preferred_element_type=jnp.float32)
                  + bg_ref[...])
    gate = jax.nn.sigmoid(gate_logit)

    # prot*(1-gate) + gene_feat*gate  ==  prot + gate*(gene_feat - prot)
    out_ref[...] = (prot + gate * (gene_feat - prot)).astype(out_ref.dtype)


def _coupler_kernel_streamed(prot_ref, gene_ref, w1_ref, b1_ref, w2_ref, b2_ref,
                             wg_ref, bg_ref, out_ref, h_acc_ref):
    """Fallback for gene_dim too large for W1 residency.
    Grid: (batch tiles [parallel], gene_dim reduction tiles [arbitrary])."""
    k = pl.program_id(1)

    @pl.when(k == 0)
    def _():
        # Initialize the accumulator with b1 (saves a broadcast-add in the epilogue).
        h_acc_ref[...] = jnp.broadcast_to(b1_ref[...].astype(jnp.float32),
                                          h_acc_ref.shape)

    gene_bf = gene_ref[...].astype(w1_ref.dtype)
    h_acc_ref[...] += jnp.dot(gene_bf, w1_ref[...],
                              preferred_element_type=jnp.float32)

    @pl.when(k == pl.num_programs(1) - 1)
    def _():
        C = prot_ref.shape[1]
        h = jnp.maximum(h_acc_ref[...], 0.0)
        gene_feat = jnp.dot(h.astype(w2_ref.dtype), w2_ref[...],
                            preferred_element_type=jnp.float32) + b2_ref[...]
        prot = prot_ref[...].astype(jnp.float32)
        wg = wg_ref[...]
        gate_logit = (jnp.dot(prot.astype(wg.dtype), wg[:C, :],
                              preferred_element_type=jnp.float32)
                      + jnp.dot(gene_feat.astype(wg.dtype), wg[C:, :],
                                preferred_element_type=jnp.float32)
                      + bg_ref[...])
        gate = jax.nn.sigmoid(gate_logit)
        out_ref[...] = (prot + gate * (gene_feat - prot)).astype(out_ref.dtype)


# --------------------------------------------------------------------------
# Tile planning (generation-aware VMEM budget)
# --------------------------------------------------------------------------

def _vmem_budget_bytes() -> int:
    """VMEM budget: ~75% of physical VMEM, leaving headroom for the runtime.
    v7x (64 MiB) -> ~48 MiB; v5e/v6e (128 MiB) -> ~96 MiB."""
    cap = 64 << 20  # conservative default: smallest generation (v7x)
    try:
        info = pltpu.get_tpu_info()
        cap = int(getattr(info, "vmem_capacity_bytes", cap)) or cap
    except Exception:
        pass
    return max(min(int(cap * 0.75), cap - (16 << 20)), 32 << 20)


def _resident_footprint(tb, G, H, C, wi):
    # 2x: BlockSpec double-buffers every operand (weights too, conservatively).
    weights = 2 * (G * H * wi + H * C * wi + 2 * C * C * wi + (H + 2 * C) * 4)
    io = 2 * (tb * C * 4 * 2 + tb * G * 4)          # prot + out + gene (f32)
    temps = tb * (6 * H + 24 * C)                   # h (f32 + bf16) + epilogue temps
    return weights + io + temps


def _streamed_footprint(tb, tk, G, H, C, wi):
    io = 2 * (tb * C * 4 * 2 + tb * tk * 4 + tk * H * wi)
    weights = 2 * (H * C * wi + 2 * C * C * wi + (H + 2 * C) * 4)
    return io + weights + tb * H * 4 + tb * (6 * H + 24 * C)


def _choose_plan(B, G, H, C, wi, budget):
    bp8 = _round_up(max(B, 1), 8)
    cands = [t for t in (512, 256, 128, 64, 32, 16, 8) if t <= bp8]
    if not cands:
        cands = [8]

    # Prefer full W1 residency.
    fitting = [t for t in cands if _resident_footprint(t, G, H, C, wi) <= budget]
    if fitting:
        # Prefer >= 2 batch tiles so the 'parallel' axis can shard across both
        # TensorCores on v7x (megacore); candidates are descending so [0] = largest.
        multi = [t for t in fitting if pl.cdiv(bp8, t) >= 2]
        return "resident", (multi[0] if multi else fitting[0]), None

    # K-streamed fallback for very large gene_dim.
    for tb in cands:
        for tk in (2048, 1024, 512, 256):
            if _streamed_footprint(tb, tk, G, H, C, wi) <= budget:
                return "streamed", tb, tk
    return "streamed", 8, 256  # last resort; still correct, just small tiles


# --------------------------------------------------------------------------
# Wrapper
# --------------------------------------------------------------------------

@functools.partial(jax.jit, static_argnames=("tb", "tk"))
def central_dogma_coupler(protein_embedding, gene_expr, params, *, tb=None, tk=None):
    """protein_embedding: [B, C] f32, gene_expr: [B, G] f32 -> [B, C] f32."""
    B, C = protein_embedding.shape
    _, G = gene_expr.shape
    H = params["w1"].shape[1]
    out_dtype = protein_embedding.dtype

    w1, b1 = params["w1"], params["b1"]
    w2, b2 = params["w2"], params["b2"]
    wg, bg = params["wg"], params["bg"]
    wi = jnp.dtype(w1.dtype).itemsize

    budget = _vmem_budget_bytes()
    mode, tb_auto, tk_auto = _choose_plan(B, G, H, C, wi, budget)
    if tb is not None:
        tb_auto = max(8, _round_up(min(tb, _round_up(B, 8)), 8))
    if tk is not None:
        mode, tk_auto = "streamed", tk
    tb = tb_auto

    # Pad batch to a multiple of tb (sublane-aligned tiles, unmasked vld/vst).
    bp = _round_up(B, tb)
    if bp != B:
        protein_embedding = jnp.pad(protein_embedding, ((0, bp - B), (0, 0)))
        gene_expr = jnp.pad(gene_expr, ((0, 0 if False else bp - B), (0, 0))) \
            if False else jnp.pad(gene_expr, ((0, bp - B), (0, 0)))
    n_batch_tiles = bp // tb

    itemsize_out = jnp.dtype(out_dtype).itemsize
    weight_bytes_small = (H * C + 2 * C * C) * wi + (H + 2 * C) * 4

    if mode == "resident":
        footprint = _resident_footprint(tb, G, H, C, wi)
        grid = (n_batch_tiles,)
        in_specs = [
            pl.BlockSpec((tb, C), lambda i: (i, 0)),      # protein_embedding (f32)
            pl.BlockSpec((tb, G), lambda i: (i, 0)),      # gene_expr (f32, cast in-kernel)
            pl.BlockSpec((G, H), lambda i: (0, 0)),       # w1 (bf16, fully resident)
            pl.BlockSpec((1, H), lambda i: (0, 0)),       # b1
            pl.BlockSpec((H, C), lambda i: (0, 0)),       # w2
            pl.BlockSpec((1, C), lambda i: (0, 0)),       # b2
            pl.BlockSpec((2 * C, C), lambda i: (0, 0)),   # wg (stacked)
            pl.BlockSpec((1, C), lambda i: (0, 0)),       # bg
        ]
        out_specs = pl.BlockSpec((tb, C), lambda i: (i, 0))
        scratch_shapes = []
        dims = ("parallel",)
        kernel = _coupler_kernel_resident
        gene_in, w1_in = gene_expr, w1
        w1_bytes = G * H * wi                              # fetched once
    else:
        tk = max(8, min(int(tk_auto), G))
        gp = _round_up(G, tk)
        gene_in, w1_in = gene_expr, w1
        if gp != G:  # zero K-padding contributes nothing to the matmul
            gene_in = jnp.pad(gene_in, ((0, 0), (0, gp - G)))
            w1_in = jnp.pad(w1_in, ((0, gp - G), (0, 0)))
        footprint = _streamed_footprint(tb, tk, G, H, C, wi)
        grid = (n_batch_tiles, gp // tk)
        in_specs = [
            pl.BlockSpec((tb, C), lambda i, k: (i, 0)),
            pl.BlockSpec((tb, tk), lambda i, k: (i, k)),
            pl.BlockSpec((tk, H), lambda i, k: (k, 0)),    # w1 streamed over K
            pl.BlockSpec((1, H), lambda i, k: (0, 0)),
            pl.BlockSpec((H, C), lambda i, k: (0, 0)),
            pl.BlockSpec((1, C), lambda i, k: (0, 0)),
            pl.BlockSpec((2 * C, C), lambda i, k: (0, 0)),
            pl.BlockSpec((1, C), lambda i, k: (0, 0)),
        ]
        out_specs = pl.BlockSpec((tb, C), lambda i, k: (i, 0))
        scratch_shapes = [pltpu.VMEM((tb, H), jnp.float32)]
        dims = ("parallel", "arbitrary")
        kernel = _coupler_kernel_streamed
        w1_bytes = n_batch_tiles * gp * H * wi             # re-streamed per batch tile

    # vmem_limit from the real footprint (never clamped below it), capped by the
    # generation-aware budget.
    vmem_limit = max(min(int(1.25 * footprint), budget), footprint, 32 << 20)

    # Honest scheduling hint for XLA.
    flops = 2 * B * (G * H + H * C + 2 * C * C)
    bytes_accessed = (B * C * 4 + B * G * 4 + B * C * itemsize_out
                      + w1_bytes + weight_bytes_small)
    cost = pl.CostEstimate(flops=flops, transcendentals=B * C,
                           bytes_accessed=bytes_accessed)

    # Note: if xprof shows exposed DMA after these tile sizes, consider
    # pipeline_mode=pl.Buffered(3) on the gene_expr / w1 BlockSpecs.
    out = pl.pallas_call(
        kernel,
        out_shape=jax.ShapeDtypeStruct((bp, C), out_dtype),
        grid=grid,
        in_specs=in_specs,
        out_specs=out_specs,
        scratch_shapes=scratch_shapes,
        compiler_params=pltpu.CompilerParams(
            dimension_semantics=dims,
            vmem_limit_bytes=vmem_limit),
        cost_estimate=cost,
    )(protein_embedding, gene_in, w1_in, b1, w2, b2, wg, bg)

    return out[:B] if bp != B else out


# --------------------------------------------------------------------------
# Params / reference
# --------------------------------------------------------------------------

def init_params(key, gene_dim, hidden_dim, coupling_dim,
                weight_dtype=jnp.bfloat16, bias_dtype=jnp.float32):
    """PyTorch-style uniform fan-in init. Weights stored [in, out] so the kernel
    computes y = x @ W + b (== PyTorch's x @ W_t.T + b). Weights bf16, biases f32.
    The gate weight is the stacked [2*C, C] matrix (concat == split-and-sum)."""
    ks = jax.random.split(key, 6)

    def lin(kw, kb, fan_in, fan_out):
        bound = 1.0 / math.sqrt(fan_in)
        w = jax.random.uniform(kw, (fan_in, fan_out), jnp.float32,
                               -bound, bound).astype(weight_dtype)
        b = jax.random.uniform(kb, (1, fan_out), jnp.float32,
                               -bound, bound).astype(bias_dtype)
        return w, b

    w1, b1 = lin(ks[0], ks[1], gene_dim, hidden_dim)
    w2, b2 = lin(ks[2], ks[3], hidden_dim, coupling_dim)
    wg, bg = lin(ks[4], ks[5], 2 * coupling_dim, coupling_dim)
    return {"w1": w1, "b1": b1, "w2": w2, "b2": b2, "wg": wg, "bg": bg}


def reference(protein_embedding, gene_expr, p):
    """Pure-JAX reference following the same precision path (bf16 MXU, f32 accum).
    Note: gene_features see bf16 quantization before the gate matmul; this matches
    the kernel but is not bit-exact vs. an all-f32 PyTorch module (atol 1e-2)."""
    f32 = jnp.float32
    ge = gene_expr.astype(p["w1"].dtype)
    h = jnp.maximum(jnp.dot(ge, p["w1"], preferred_element_type=f32) + p["b1"], 0.0)
    gene_feat = jnp.dot(h.astype(p["w2"].dtype), p["w2"],
                        preferred_element_type=f32) + p["b2"]
    prot = protein_embedding.astype(f32)
    gate_in = jnp.concatenate([prot.astype(p["wg"].dtype),
                               gene_feat.astype(p["wg"].dtype)], axis=-1)
    gate = jax.nn.sigmoid(jnp.dot(gate_in, p["wg"],
                                  preferred_element_type=f32) + p["bg"])
    return (prot * (1.0 - gate) + gene_feat * gate).astype(protein_embedding.dtype)


if __name__ == "__main__":
    # Small shapes consistent with the module (coupling_dim / gene_dim / hidden
    # scaled down); batch large enough to exercise a multi-tile batch grid.
    B, GENE_DIM, HIDDEN_DIM, COUPLING_DIM = 256, 512, 256, 128

    key = jax.random.PRNGKey(0)
    k_prot, k_gene, k_params = jax.random.split(key, 3)

    protein_embedding = jax.random.normal(k_prot, (B, COUPLING_DIM), jnp.float32)
    gene_expr = jax.random.normal(k_gene, (B, GENE_DIM), jnp.float32)
    params = init_params(k_params, GENE_DIM, HIDDEN_DIM, COUPLING_DIM)

    # Auto-planned (resident-W1) path.
    out = central_dogma_coupler(protein_embedding, gene_expr, params)
    out = jax.block_until_ready(out)

    ref = reference(protein_embedding, gene_expr, params)
    assert out.shape == (B, COUPLING_DIM)
    max_err = jnp.max(jnp.abs(out - ref))
    assert jnp.allclose(out, ref, atol=1e-2, rtol=1e-2), f"max abs err {max_err}"

    # Also exercise the K-streamed fallback path (forced via small tk).
    out_s = jax.block_until_ready(
        central_dogma_coupler(protein_embedding, gene_expr, params, tb=128, tk=128))
    max_err_s = jnp.max(jnp.abs(out_s - ref))
    assert jnp.allclose(out_s, ref, atol=1e-2, rtol=1e-2), f"max abs err {max_err_s}"

    print("KERNEL_OK")
</pallas_src>

<mosaic_0001>
module attributes {stable_mosaic.version = 11 : i64} {
  func.func @_coupler_kernel_resident(%arg0: i32, %arg1: memref<128x128xf32, #tpu.memory_space<vmem>>, %arg2: memref<128x512xf32, #tpu.memory_space<vmem>>, %arg3: memref<512x256xbf16, #tpu.memory_space<vmem>>, %arg4: memref<1x256xf32, #tpu.memory_space<vmem>>, %arg5: memref<256x128xbf16, #tpu.memory_space<vmem>>, %arg6: memref<1x128xf32, #tpu.memory_space<vmem>>, %arg7: memref<256x128xbf16, #tpu.memory_space<vmem>>, %arg8: memref<1x128xf32, #tpu.memory_space<vmem>>, %arg9: memref<128x128xf32, #tpu.memory_space<vmem>>) attributes {dimension_semantics = [#tpu.dimension_semantics<parallel>], iteration_bounds = array<i64: 2>, scalar_prefetch = 0 : i64, scratch_operands = 0 : i64, tpu.core_type = #tpu.core_type<tc>, window_params = [{transform_indices = @transform_0, window_bounds = array<i64: 128, 128>}, {transform_indices = @transform_1, window_bounds = array<i64: 128, 512>}, {pipeline_mode = #tpu.pipeline_mode<synchronous>, transform_indices = @transform_2, window_bounds = array<i64: 512, 256>}, {pipeline_mode = #tpu.pipeline_mode<synchronous>, transform_indices = @transform_3, window_bounds = array<i64: 1, 256>}, {pipeline_mode = #tpu.pipeline_mode<synchronous>, transform_indices = @transform_4, window_bounds = array<i64: 256, 128>}, {pipeline_mode = #tpu.pipeline_mode<synchronous>, transform_indices = @transform_5, window_bounds = array<i64: 1, 128>}, {pipeline_mode = #tpu.pipeline_mode<synchronous>, transform_indices = @transform_6, window_bounds = array<i64: 256, 128>}, {pipeline_mode = #tpu.pipeline_mode<synchronous>, transform_indices = @transform_7, window_bounds = array<i64: 1, 128>}, {transform_indices = @transform_8, window_bounds = array<i64: 128, 128>}]} {
    %c0 = arith.constant 0 : index
    %c0_0 = arith.constant 0 : index
    %0 = vector.load %arg2[%c0, %c0_0] : memref<128x512xf32, #tpu.memory_space<vmem>>, vector<128x512xf32>
    %1 = arith.truncf %0 : vector<128x512xf32> to vector<128x512xbf16>
    %c0_1 = arith.constant 0 : index
    %c0_2 = arith.constant 0 : index
    %2 = vector.load %arg3[%c0_1, %c0_2] : memref<512x256xbf16, #tpu.memory_space<vmem>>, vector<512x256xbf16>
    %cst = arith.constant dense<0.000000e+00> : vector<128x256xf32>
    %3 = tpu.matmul %1, %2, %cst {dimension_numbers = #tpu.dot_dimension_numbers<[1], [0], [0], [1], [0, 0, 1, 1], [], []>} : vector<128x512xbf16>, vector<512x256xbf16>, vector<128x256xf32> -> vector<128x256xf32>
    %c0_3 = arith.constant 0 : index
    %c0_4 = arith.constant 0 : index
    %4 = vector.load %arg4[%c0_3, %c0_4] : memref<1x256xf32, #tpu.memory_space<vmem>>, vector<1x256xf32>
    %5 = vector.broadcast %4 : vector<1x256xf32> to vector<128x256xf32>
    %6 = arith.addf %3, %5 : vector<128x256xf32>
    %cst_5 = arith.constant 0.000000e+00 : f32
    %7 = vector.broadcast %cst_5 : f32 to vector<128x256xf32>
    %8 = arith.maximumf %6, %7 : vector<128x256xf32>
    %9 = arith.truncf %8 : vector<128x256xf32> to vector<128x256xbf16>
    %c0_6 = arith.constant 0 : index
    %c0_7 = arith.constant 0 : index
    %10 = vector.load %arg5[%c0_6, %c0_7] : memref<256x128xbf16, #tpu.memory_space<vmem>>, vector<256x128xbf16>
    %cst_8 = arith.constant dense<0.000000e+00> : vector<128x128xf32>
    %11 = tpu.matmul %9, %10, %cst_8 {dimension_numbers = #tpu.dot_dimension_numbers<[1], [0], [0], [1], [0, 0, 1, 1], [], []>} : vector<128x256xbf16>, vector<256x128xbf16>, vector<128x128xf32> -> vector<128x128xf32>
    %c0_9 = arith.constant 0 : index
    %c0_10 = arith.constant 0 : index
    %12 = vector.load %arg6[%c0_9, %c0_10] : memref<1x128xf32, #tpu.memory_space<vmem>>, vector<1x128xf32>
    %13 = vector.broadcast %12 : vector<1x128xf32> to vector<128x128xf32>
    %14 = arith.addf %11, %13 : vector<128x128xf32>
    %c0_11 = arith.constant 0 : index
    %c0_12 = arith.constant 0 : index
    %15 = vector.load %arg1[%c0_11, %c0_12] : memref<128x128xf32, #tpu.memory_space<vmem>>, vector<128x128xf32>
    %c0_13 = arith.constant 0 : index
    %c0_14 = arith.constant 0 : index
    %16 = vector.load %arg7[%c0_13, %c0_14] : memref<256x128xbf16, #tpu.memory_space<vmem>>, vector<256x128xbf16>
    %17 = arith.truncf %15 : vector<128x128xf32> to vector<128x128xbf16>
    %18 = vector.extract_strided_slice %16 {offsets = [0, 0], sizes = [128, 128], strides = [1, 1]} : vector<256x128xbf16> to vector<128x128xbf16>
    %cst_15 = arith.constant dense<0.000000e+00> : vector<128x128xf32>
    %19 = tpu.matmul %17, %18, %cst_15 {dimension_numbers = #tpu.dot_dimension_numbers<[1], [0], [0], [1], [0, 0, 1, 1], [], []>} : vector<128x128xbf16>, vector<128x128xbf16>, vector<128x128xf32> -> vector<128x128xf32>
    %20 = arith.truncf %14 : vector<128x128xf32> to vector<128x128xbf16>
    %21 = vector.extract_strided_slice %16 {offsets = [128, 0], sizes = [128, 128], strides = [1, 1]} : vector<256x128xbf16> to vector<128x128xbf16>
    %cst_16 = arith.constant dense<0.000000e+00> : vector<128x128xf32>
    %22 = tpu.matmul %20, %21, %cst_16 {dimension_numbers = #tpu.dot_dimension_numbers<[1], [0], [0], [1], [0, 0, 1, 1], [], []>} : vector<128x128xbf16>, vector<128x128xbf16>, vector<128x128xf32> -> vector<128x128xf32>
    %23 = arith.addf %19, %22 : vector<128x128xf32>
    %c0_17 = arith.constant 0 : index
    %c0_18 = arith.constant 0 : index
    %24 = vector.load %arg8[%c0_17, %c0_18] : memref<1x128xf32, #tpu.memory_space<vmem>>, vector<1x128xf32>
    %25 = vector.broadcast %24 : vector<1x128xf32> to vector<128x128xf32>
    %26 = arith.addf %23, %25 : vector<128x128xf32>
    %27 = arith.negf %26 : vector<128x128xf32>
    %28 = math.exp %27 : vector<128x128xf32>
    %cst_19 = arith.constant 1.000000e+00 : f32
    %29 = vector.broadcast %cst_19 : f32 to vector<128x128xf32>
    %30 = arith.addf %29, %28 : vector<128x128xf32>
    %31 = arith.divf %29, %30 : vector<128x128xf32>
    %32 = arith.subf %14, %15 : vector<128x128xf32>
    %33 = arith.mulf %31, %32 : vector<128x128xf32>
    %34 = arith.addf %15, %33 : vector<128x128xf32>
    %c0_20 = arith.constant 0 : index
    %c0_21 = arith.constant 0 : index
    %35 = vector.load %arg9[%c0_20, %c0_21] : memref<128x128xf32, #tpu.memory_space<vmem>>, vector<128x128xf32>
    tpu.vector_store %arg9[%c0_20, %c0_21], %34 {strides = array<i32>} : memref<128x128xf32, #tpu.memory_space<vmem>>, vector<128x128xf32>,
    return
  }
  func.func @transform_0(%arg0: i32) -> (i32, i32) {
    %c0_i32 = arith.constant 0 : i32
    %c0_i32_0 = arith.constant 0 : i32
    return %arg0, %c0_i32 : i32, i32
  }
  func.func @transform_1(%arg0: i32) -> (i32, i32) {
    %c0_i32 = arith.constant 0 : i32
    %c0_i32_0 = arith.constant 0 : i32
    return %arg0, %c0_i32 : i32, i32
  }
  func.func @transform_2(%arg0: i32) -> (i32, i32) {
    %c0_i32 = arith.constant 0 : i32
    %c0_i32_0 = arith.constant 0 : i32
    %c0_i32_1 = arith.constant 0 : i32
    return %c0_i32, %c0_i32_0 : i32, i32
  }
  func.func @transform_3(%arg0: i32) -> (i32, i32) {
    %c0_i32 = arith.constant 0 : i32
    %c0_i32_0 = arith.constant 0 : i32
    %c0_i32_1 = arith.constant 0 : i32
    return %c0_i32, %c0_i32_0 : i32, i32
  }
  func.func @transform_4(%arg0: i32) -> (i32, i32) {
    %c0_i32 = arith.constant 0 : i32
    %c0_i32_0 = arith.constant 0 : i32
    %c0_i32_1 = arith.constant 0 : i32
    return %c0_i32, %c0_i32_0 : i32, i32
  }
  func.func @transform_5(%arg0: i32) -> (i32, i32) {
    %c0_i32 = arith.constant 0 : i32
    %c0_i32_0 = arith.constant 0 : i32
    %c0_i32_1 = arith.constant 0 : i32
    return %c0_i32, %c0_i32_0 : i32, i32
  }
  func.func @transform_6(%arg0: i32) -> (i32, i32) {
    %c0_i32 = arith.constant 0 : i32
    %c0_i32_0 = arith.constant 0 : i32
    %c0_i32_1 = arith.constant 0 : i32
    return %c0_i32, %c0_i32_0 : i32, i32
  }
  func.func @transform_7(%arg0: i32) -> (i32, i32) {
    %c0_i32 = arith.constant 0 : i32
    %c0_i32_0 = arith.constant 0 : i32
    %c0_i32_1 = arith.constant 0 : i32
    return %c0_i32, %c0_i32_0 : i32, i32
  }
  func.func @transform_8(%arg0: i32) -> (i32, i32) {
    %c0_i32 = arith.constant 0 : i32
    %c0_i32_0 = arith.constant 0 : i32
    return %arg0, %c0_i32 : i32, i32
  }
}

</mosaic_0001>

<bundles_post_ra>
// kernel: central_dogma_coupler.1
= control target key start
LH: loop header
LB: loop body
LE: loop exit
PB: predicated region body
PF: predicated region fallthrough
CT: control target
= control target key end

     0   :  { %s3674_s0 = inlined_call_operand.hbm [shape: f32[256,128], index: 0, kind: input, shape index: {}]   ;;  %s3675_s1 = inlined_call_operand.hbm [shape: f32[256,512], index: 1, kind: input, shape index: {}]   ;;  %s3676_s2 = inlined_call_operand.hbm [shape: bf16[512,256], index: 2, kind: input, shape index: {}]   ;;  %s3677_s3 = inlined_call_operand.vmem [shape: f32[1,256], index: 3, kind: input, shape index: {}]   ;;  %s3678_s4 = inlined_call_operand.hbm [shape: bf16[256,128], index: 4, kind: input, shape index: {}]   ;;  %s3679_s5 = inlined_call_operand.vmem [shape: f32[1,128], index: 5, kind: input, shape index: {}]   ;;  %s3680_s6 = inlined_call_operand.hbm [shape: bf16[256,128], index: 6, kind: input, shape index: {}]   ;;  %s3681_s7 = inlined_call_operand.vmem [shape: f32[1,128], index: 7, kind: input, shape index: {}]   ;;  %s3682_s8 = inlined_call_operand.hbm [shape: f32[256,128], index: 8, kind: output, shape index: {}]  }
   0x1   :  { %3690 = sst [smem:[#allocation19_spill]] %s3674_s0 }
   0x2   :  { %3691 = sst [smem:[#allocation20_spill]] %s3676_s2 }
   0x3   :  { %3692 = sst [smem:[#allocation21_spill]] %s3678_s4 }
   0x4   :  { %3693 = sst [smem:[#allocation22_spill]] %s3680_s6 }
   0x5   :  { %13 = vsyncpa [#allocation3], 0 }
   0x6   :  { %15 = vsyncpa [#allocation3 + $0x1], 0 }
   0x7   :  { %16 = vsyncpa [#allocation6], 0 }
   0x8   :  { %18 = vsyncpa [#allocation6 + $0x1], 0 }
   0x9   :  { %19 = vsyncpa [#allocation9], 0 }
   0xa   :  { %20 = vsyncpa [#allocation4], 0 }
   0xb   :  { %22 = vsyncpa [#allocation4 + $0x1], 0  ;;  %s3033_s27 = smov 0   ;;  %s3035_s28 = smov 0  }
   0xc   :  { %s3037_s29 = smov 0   ;;  %s3039_s30 = smov 0  }
   0xd LB: > { %3694 = sst [smem:[#allocation17_spill]] %s2960_s27  ;;  %s3054_s9 = sadd.s32 4294967295, %s2972_s30   ;;  %s2972_s30 = sphi %s3039_s30, %s3724_s30   ;;  %s2968_s29 = sphi %s3037_s29, %s3723_s29   ;;  %s2964_s28 = sphi %s3035_s28, %s3722_s28   ;;  %s2960_s27 = sphi %s3033_s27, %s3721_s27  }
   0xe   : > { %s2085_s10 = sadd.s32 4294967294, %s2972_s30   ;;  %p48_p0 = scmp.ne.s32.totalorder %s2964_s28, %s2960_s27 }
   0xf   : > { %p3683_p1 = scmp.eq.s32.totalorder %s3054_s9, 0  ;;  %p230_p3 = scmp.eq.s32.totalorder %s2085_s10, 1 }
  0x10   : > { %p2086_p5 = scmp.ge.s32.totalorder %s2972_s30, 1  ;;  %p237_p7 = scmp.lt.s32.totalorder %s2972_s30, 3 }
  0x11   : > { %p3063_p4 = por %p3683_p1, %p48_p0  ;;  %p3068_p6 = por %p230_p3, %p48_p0 }
  0x12   : > { %p3073_p8 = pnand %p2086_p5, %p237_p7  ;;  %s2974_s14 = smov [#allocation7]  }
  0x13   : > { %s3695_s11 = scalar_select %p3063_p4, 1, 0 }
  0x14   : > { %s3696_s12 = scalar_select %p3068_p6, 1, 0 }
  0x15   : > { %s3698_s13 = scalar_select %p3073_p8, 1, 0 }
  0x16   : > { %3697 = sst [smem:[#allocation18_spill]] %s3696_s12  ;;  %s249_s15 = sshll.u32 %s2974_s14, 4  ;;  %s3077_s15 = int_to_ptr.vmem [resolvable:$true] %s249_s15 }
  0x17   : > { %p2486_p9 = pneg %p3073_p8  ;;  %s2975_s17 = smov [#allocation8]  }
  0x18   : > { %s265_s18 = sshll.u32 %s2975_s17, 4  ;;  %s3700_s2 = sld [smem:[#allocation20_spill]]  ;;  %s3088_s18 = int_to_ptr.vmem [resolvable:$true] %s265_s18 }
  0x19   : > { %p3084_p11 = pnand %p2486_p9, %p3683_p1 }
  0x1b   : > { %p3098_p13 = pneg %p3084_p11 }
  0x1e   : > { %s2750_s21 = scalar_lea.hbm %s3700_s2, 8192 }
  0x1f   : > { %p2751_p12 = scmp.ne.s32.totalorder %s3700_s2, %s2750_s21  ;;  %p2757_p5 = scmp.lt.u32.totalorder %s2750_s21, %s3700_s2 }
  0x21   : > { %p2753_p0 = pnand %p3098_p13, %p2751_p12 }
  0x23   : > { %p2754_p3 = pneg %p2753_p0 }
  0x25   : > { %p2759_p7 = pnand %p2757_p5, %p2754_p3 }
  0x27   : > { %2762 = shalt.err (!%p2759_p7)
}
  0x28   : > { %s2763_s10 = scalar_lea.vmem %s3077_s15, 8192  ;;  %p2771_p2 = scmp.lt.s32.totalorder %s3077_s15, %s3077_s15 }
  0x29   : > { %p2764_p9 = scmp.ne.s32.totalorder %s3077_s15, %s2763_s10  ;;  %p2772_p6 = scmp.lt.s32.totalorder %s2763_s10, %s2763_s10 }
  0x2b   : > { %p2766_p10 = pnand %p2764_p9, %p3098_p13  ;;  %p2773_p12 = por %p2772_p6, %p2771_p2 }
  0x2d   : > { %p2767_p1 = pneg %p2766_p10 }
  0x2f   : > { %p2774_p0 = pnand %p2773_p12, %p2767_p1 }
  0x31   : > { %2777 = shalt.err (!%p2774_p0)
}
  0x32   : > { %s3685_s14 = smov 128   ;;  %s3686_s17 = smov 8  }
  0x33   : > { %2489 = dma.hbm_to_vmem [thread:$0]  (!%p3084_p11), %s3700_s2, 8192, %s3077_s15, [#allocation6], %s3685_s14, %s3685_s14, %s3686_s17  }
  0x34   : > { %s3702_s4 = sld [smem:[#allocation21_spill]] }
  0x3a   : > { %s2778_s23 = scalar_lea.hbm %s3702_s4, 2048 }
  0x3b   : > { %p2779_p1 = scmp.ne.s32.totalorder %s3702_s4, %s2778_s23  ;;  %p2785_p10 = scmp.lt.u32.totalorder %s2778_s23, %s3702_s4 }
  0x3d   : > { %p2781_p2 = pnand %p2779_p1, %p3098_p13 }
  0x3f   : > { %p2782_p6 = pneg %p2781_p2 }
  0x41   : > { %p2787_p3 = pnand %p2785_p10, %p2782_p6 }
  0x43   : > { %2790 = shalt.err (!%p2787_p3)
}
  0x44   : > { %s2791_s15 = scalar_lea.vmem %s3088_s18, 2048  ;;  %p2799_p12 = scmp.lt.s32.totalorder %s3088_s18, %s3088_s18 }
  0x45   : > { %p2792_p5 = scmp.ne.s32.totalorder %s3088_s18, %s2791_s15  ;;  %p2800_p0 = scmp.lt.s32.totalorder %s2791_s15, %s2791_s15 }
  0x47   : > { %p2794_p7 = pnand %p2792_p5, %p3098_p13  ;;  %p2801_p1 = por %p2800_p0, %p2799_p12 }
  0x49   : > { %p2795_p9 = pneg %p2794_p7 }
  0x4b   : > { %p2802_p2 = pnand %p2801_p1, %p2795_p9 }
  0x4d   : > { %2805 = shalt.err (!%p2802_p2)
}
  0x4e   : > { %s2978_s19 = smov 64   ;;  %s2979_s12 = smov 4  }
  0x4f   : > { %2492 = dma.hbm_to_vmem [thread:$0]  (!%p3084_p11), %s3702_s4, 2048, %s3088_s18, [#allocation9], %s2978_s19, %s2978_s19, %s2979_s12  }
  0x50   : > { %s2980_s22 = smov [#allocation10]   ;;  %s3146_s25 = sadd.s32 1, %s2972_s30  }
  0x51   : > { %s281_s23 = sshll.u32 %s2980_s22, 4  ;;  %s3703_s6 = sld [smem:[#allocation22_spill]]  ;;  %s282_s23 = int_to_ptr.vmem [resolvable:$true] %s281_s23 }
  0x57   : > { %s2806_s15 = scalar_lea.hbm %s3703_s6, 2048 }
  0x58   : > { %p2807_p6 = scmp.ne.s32.totalorder %s3703_s6, %s2806_s15  ;;  %p2813_p5 = scmp.lt.u32.totalorder %s2806_s15, %s3703_s6 }
  0x5a   : > { %p2809_p10 = pnand %p2807_p6, %p3098_p13 }
  0x5c   : > { %p2810_p3 = pneg %p2809_p10 }
  0x5e   : > { %p2815_p7 = pnand %p2813_p5, %p2810_p3 }
  0x60   : > { %2818 = shalt.err (!%p2815_p7)
}
  0x61   : > { %s2819_s18 = scalar_lea.vmem %s282_s23, 2048  ;;  %p2827_p1 = scmp.lt.s32.totalorder %s282_s23, %s282_s23 }
  0x62   : > { %p2820_p9 = scmp.ne.s32.totalorder %s282_s23, %s2819_s18  ;;  %p2828_p2 = scmp.lt.s32.totalorder %s2819_s18, %s2819_s18 }
  0x64   : > { %p2822_p12 = pnand %p2820_p9, %p3098_p13  ;;  %p2829_p4 = por %p2828_p2, %p2827_p1 }
  0x66   : > { %p2823_p0 = pneg %p2822_p12 }
  0x68   : > { %p2830_p8 = pnand %p2829_p4, %p2823_p0 }
  0x6a   : > { %2833 = shalt.err (!%p2830_p8)
}
  0x6b   : > { %2495 = dma.hbm_to_vmem [thread:$0]  (!%p3084_p11), %s3703_s6, 2048, %s282_s23, [#allocation9], %s2978_s19, %s2978_s19, %s2979_s12  }
  0x6c   : > { %s32_s2 = ssub.s32 %s2972_s30, %s3146_s25  ;;  %s35_s27 = sadd.s32 1, %s2968_s29 }
  0x6d   : > { %p33_p4 = scmp.eq.s32.totalorder %s32_s2, 0  ;;  %p42_p8 = scmp.ne.s32.totalorder %s2968_s29, %s2964_s28 }
  0x6e   : > { %p43_p13 = scmp.eq.s32.totalorder %s2972_s30, 0  ;;  %p2510_p6 = scmp.lt.s32.totalorder %s2972_s30, 2 }
  0x6f   : > { %s3174_s16 = scalar_select %p33_p4, %s2968_s29, %s35_s27  }
  0x70   : > { %p44_p10 = por %p43_p13, %p42_p8  ;;  %p3704_p3 = scmp.eq.s32.totalorder %s3054_s9, 1 }
  0x71   : > { %s3183_s20 = sand.u32 1, %s2968_s29   ;;  %s2224_s19 = sshll.u32 %s2972_s30, 11 }
  0x72   : > { %p3178_p5 = por %p3704_p3, %p42_p8  ;;  %s2091_s12 = sshll.u32 %s3183_s20, 7 }
  0x73   : > { %s3706_s0 = sld [smem:[#allocation19_spill]]  ;;  %s302_s26 = scalar_lea.vmem [#allocation2], %s2091_s12 }
  0x74   : > { %s309_s10 = sshll.u32 %s302_s26, 4  ;;  %p3192_p11 = pnand %p2510_p6, %p44_p10  ;;  %s3196_s10 = int_to_ptr.vmem [resolvable:$true] %s309_s10 }
  0x75   : > { %s299_s14 = scalar_lea.sflag [#allocation3], %s3183_s20 }
  0x76   : > { %p2836_p9 = pneg %p3192_p11 }
  0x79   : > { %s3190_s23 = scalar_lea.hbm %s3706_s0, %s2224_s19  ;;  %s2839_s19 = scalar_lea.hbm %s3706_s0, 4096 }
  0x7a   : > { %s2834_s17 = scalar_lea.hbm %s3190_s23, 2048  ;;  %p2840_p1 = scmp.lt.u32.totalorder %s3190_s23, %s3706_s0 }
  0x7b   : > { %p2835_p7 = scmp.ne.s32.totalorder %s3190_s23, %s2834_s17  ;;  %p2841_p2 = scmp.lt.u32.totalorder %s2839_s19, %s2834_s17 }
  0x7c   : > { %p2843_p8 = scmp.lt.u32.totalorder %s2834_s17, %s3190_s23 }
  0x7d   : > { %p2837_p12 = pnand %p2836_p9, %p2835_p7  ;;  %p2842_p4 = por %p2841_p2, %p2840_p1 }
  0x7f   : > { %p2838_p0 = pneg %p2837_p12  ;;  %p2844_p13 = por %p2843_p8, %p2842_p4 }
  0x81   : > { %p2845_p6 = pnand %p2844_p13, %p2838_p0 }
  0x83   : > { %2848 = shalt.err (!%p2845_p6)
}
  0x84   : > { %s2849_s22 = scalar_lea.vmem %s3196_s10, 2048  ;;  %s2981_s26 = smov [#allocation2]  }
  0x85   : > { %p2850_p10 = scmp.ne.s32.totalorder %s3196_s10, %s2849_s22  ;;  %s2854_s2 = sshll.u32 %s2981_s26, 4  ;;  %s2855_s2 = int_to_ptr.vmem [resolvable:$false] %s2854_s2 }
  0x86   : > { %s2856_s27 = scalar_lea.vmem %s2855_s2, 4096  ;;  %p2857_p12 = scmp.lt.s32.totalorder %s3196_s10, %s2855_s2 }
  0x87   : > { %p2852_p3 = pnand %p2850_p10, %p2836_p9  ;;  %p2858_p1 = scmp.lt.s32.totalorder %s2856_s27, %s2849_s22 }
  0x89   : > { %p2853_p7 = pneg %p2852_p3  ;;  %p2859_p2 = por %p2858_p1, %p2857_p12 }
  0x8b   : > { %p2860_p4 = pnand %p2859_p2, %p2853_p7 }
  0x8d   : > { %2863 = shalt.err (!%p2860_p4)
}
  0x8e   : > { %s3708_s17 = smov 8   ;;  %s3709_s19 = smov 128  }
  0x8f   : > { %2499 = dma.hbm_to_vmem [thread:$0]  (!%p3192_p11), %s3190_s23, 2048, %s3196_s10, %s299_s14, %s3709_s19, %s3709_s19, %s3708_s17  }
  0x90   : > { %s2094_s12 = sshll.u32 %s3183_s20, 9  ;;  %s2226_s21 = sshll.u32 %s2972_s30, 13 }
  0x91   : > { %s3235_s2 = scalar_lea.hbm %s3675_s1, %s2226_s21  ;;  %s323_s27 = scalar_lea.vmem [#allocation5], %s2094_s12 }
  0x92   : > { %s331_s18 = sshll.u32 %s323_s27, 4  ;;  %s3710_s0 = sand.u32 1, %s2972_s30   ;;  %s3237_s18 = int_to_ptr.vmem [resolvable:$true] %s331_s18 }
  0x93   : > { %s3241_s4 = scalar_lea.sflag [#allocation6], %s3710_s0  ;;  %s2864_s6 = scalar_lea.hbm %s3235_s2, 8192 }
  0x94   : > { %p2865_p0 = scmp.ne.s32.totalorder %s3235_s2, %s2864_s6  ;;  %s2869_s10 = scalar_lea.hbm %s3675_s1, 16384 }
  0x95   : > { %p2870_p6 = scmp.lt.u32.totalorder %s3235_s2, %s3675_s1  ;;  %p2871_p10 = scmp.lt.u32.totalorder %s2869_s10, %s2864_s6 }
  0x96   : > { %p2867_p8 = pnand %p2865_p0, %p2836_p9  ;;  %p2873_p7 = scmp.lt.u32.totalorder %s2864_s6, %s3235_s2 }
  0x97   : > { %p2872_p3 = por %p2871_p10, %p2870_p6 }
  0x98   : > { %p2868_p13 = pneg %p2867_p8 }
  0x99   : > { %p2874_p12 = por %p2873_p7, %p2872_p3 }
  0x9b   : > { %p2875_p1 = pnand %p2874_p12, %p2868_p13 }
  0x9d   : > { %2878 = shalt.err (!%p2875_p1)
}
  0x9e   : > { %s2879_s0 = scalar_lea.vmem %s3237_s18, 8192  ;;  %s2982_s19 = smov [#allocation5]  }
  0x9f   : > { %p2880_p2 = scmp.ne.s32.totalorder %s3237_s18, %s2879_s0  ;;  %s2884_s12 = sshll.u32 %s2982_s19, 4  ;;  %s2885_s12 = int_to_ptr.vmem [resolvable:$false] %s2884_s12 }
  0xa0   : > { %s2886_s21 = scalar_lea.vmem %s2885_s12, 16384  ;;  %p2887_p8 = scmp.lt.s32.totalorder %s3237_s18, %s2885_s12 }
  0xa1   : > { %p2882_p4 = pnand %p2880_p2, %p2836_p9  ;;  %p2888_p6 = scmp.lt.s32.totalorder %s2886_s21, %s2879_s0 }
  0xa3   : > { %p2883_p0 = pneg %p2882_p4  ;;  %p2889_p10 = por %p2888_p6, %p2887_p8 }
  0xa5   : > { %p2890_p3 = pnand %p2889_p10, %p2883_p0 }
  0xa7   : > { %2893 = shalt.err (!%p2890_p3)
}
  0xa8   : > { %s2983_s6 = smov 512   ;;  %s2984_s22 = smov 32  }
  0xa9   : > { %2502 = dma.hbm_to_vmem [thread:$0]  (!%p3192_p11), %s3235_s2, 8192, %s3237_s18, %s3241_s4, %s2983_s6, %s2983_s6, %s2984_s22  }
  0xaa   : > { %p3711_p9 = scmp.ne.s32.totalorder %s3698_s13, 0 }
  0xab   : > { %s3270_s26 = sand.u32 (!%p3711_p9), 1, %s2964_s28   ;;  %p3712_p13 = scmp.ne.s32.totalorder (!%p3711_p9), %s3695_s11, 0 }
  0xac   : > { %343 = sbr.rel (%p3711_p9) target bundleno = 1113 (0x459), region = 52  ;;  %s2099_s27 = sshll.u32 (!%p3711_p9), %s3270_s26, 7 }
  0xad   : > { %s346_s20 = scalar_lea.sflag (!%p3711_p9), [#allocation3], %s3270_s26  ;;  %s3276_s23 = scalar_lea.vmem (!%p3711_p9), [#allocation2], %s2099_s27 }
  0xb3   : > { %2939 = dma.done.wait (%p3712_p13), %s346_s20, 2048  }
  0xb4   : > { %2941 = vsyncadd (%p3712_p13), %s346_s20, 4294965248  ;;  %s354_s4 = sand.u32 1, %s3054_s9   ;;  %s2100_s13 = sshll.u32 %s3270_s26, 9 }
  0xb5   : > { %s355_s15 = scalar_lea.sflag [#allocation6], %s354_s4  ;;  %s3284_s18 = scalar_lea.vmem [#allocation5], %s2100_s13 }
  0xb6   : > { %2943 = dma.done.wait (%p3712_p13), %s355_s15, 8192  }
  0xb7   : > { %2945 = vsyncadd (%p3712_p13), %s355_s15, 4294959104  ;;  %p3713_p11 = scmp.eq.s32.totalorder %s3054_s9, 0 }
  0xb9   : > { %2947 = dma.done.wait (%p3713_p11), [#allocation6], 8192   ;;  %p3714_p7 = pmov %p3713_p11 }
  0xbb   : > { %2949 = vsyncadd (%p3714_p7), [#allocation6], 4294959104  ;;  %p3715_p12 = pmov %p3714_p7 }
  0xbc   : > { %p3716_p1 = pmov %p3714_p7 }
  0xbd   : > { %2951 = dma.done.wait (%p3715_p12), [#allocation9], 4096  }
  0xbe   : > { %2953 = vsyncadd (%p3716_p1), [#allocation9], 4294963200  ;;  %v2558_v0 = vld [vmem:[#allocation7 + $0x4] ss:$8 sps:$4 sm:$0xff]   ;;  %v2560_v1 = vld [vmem:[#allocation7] ss:$8 sps:$4 sm:$0xff]  }
  0xbf   : > { %904 = vmatprep.subr.bf16.mxu0 %v2558_v0  ;;  %v2561_v2 = vld [vmem:[#allocation7 + $0x14] ss:$8 sps:$4 sm:$0xff]   ;;  %v2563_v3 = vld [vmem:[#allocation7 + $0x10] ss:$8 sps:$4 sm:$0xff]   ;;  %v2564_v4 = vld [vmem:[#allocation7 + $0x24] ss:$8 sps:$4 sm:$0xff]  }
  0xc0   : > { %905 = vmatpush1.bf16.msra.mxu0 %v2560_v1  ;;  %v2566_v5 = vld [vmem:[#allocation7 + $0x20] ss:$8 sps:$4 sm:$0xff]   ;;  %v2567_v6 = vld [vmem:[#allocation7 + $0x34] ss:$8 sps:$4 sm:$0xff]   ;;  %v2569_v7 = vld [vmem:[#allocation7 + $0x30] ss:$8 sps:$4 sm:$0xff]  }
  0xc1   : > { %906 = vmatprep.subr.bf16.mxu0 %v2561_v2  ;;  %v2570_v8 = vld [vmem:[#allocation7 + $0x44] ss:$8 sps:$4 sm:$0xff]   ;;  %v2572_v9 = vld [vmem:[#allocation7 + $0x40] ss:$8 sps:$4 sm:$0xff]   ;;  %v2573_v10 = vld [vmem:[#allocation7 + $0x54] ss:$8 sps:$4 sm:$0xff]  }
  0xc2   : > { %v2575_v11 = vld [vmem:[#allocation7 + $0x50] ss:$8 sps:$4 sm:$0xff]   ;;  %v2576_v12 = vld [vmem:[#allocation7 + $0x64] ss:$8 sps:$4 sm:$0xff]   ;;  %v2578_v16 = vld [vmem:[#allocation7 + $0x60] ss:$8 sps:$4 sm:$0xff]  }
  0xc3   : > { %v413_v13 = vld [vmem:[%s3284_s18 + $0x8] sm:$0xff]  ;;  %v2579_v17 = vld [vmem:[#allocation7 + $0x74] ss:$8 sps:$4 sm:$0xff]   ;;  %v2581_v18 = vld [vmem:[#allocation7 + $0x70] ss:$8 sps:$4 sm:$0xff]   ;;  %s3567_s19 = scalar_lea.vmem [#allocation11], %s2099_s27 }
  0xc4   : > { %907 = vmatpush1.bf16.msra.mxu0 %v2563_v3  ;;  %v417_v14 = vld [vmem:[%s3284_s18 + $0x28] sm:$0xff]  ;;  %v2585_v21 = vld [vmem:[#allocation7 + $0x94] ss:$8 sps:$4 sm:$0xff]   ;;  %v2587_v22 = vld [vmem:[#allocation7 + $0x90] ss:$8 sps:$4 sm:$0xff]   ;;  %s2227_s12 = sshll.u32 %s3054_s9, 11 }
  0xc5   : > { %908 = vmatprep.subr.bf16.mxu0 %v2564_v4  ;;  %v477_v15 = vpack.c.bf16 %v417_v14, %v413_v13  ;;  %v2582_v19 = vld [vmem:[#allocation7 + $0x84] ss:$8 sps:$4 sm:$0xff]   ;;  %v2584_v20 = vld [vmem:[#allocation7 + $0x80] ss:$8 sps:$4 sm:$0xff]   ;;  %v2591_v25 = vld [vmem:[#allocation7 + $0xb4] ss:$8 sps:$4 sm:$0xff]   ;;  %s3624_s27 = scalar_lea.hbm %s3682_s8, %s2227_s12 }
  0xc6   : > { %v2588_v23 = vld [vmem:[#allocation7 + $0xa4] ss:$8 sps:$4 sm:$0xff]   ;;  %v2590_v24 = vld [vmem:[#allocation7 + $0xa0] ss:$8 sps:$4 sm:$0xff]   ;;  %v2593_v26 = vld [vmem:[#allocation7 + $0xb0] ss:$8 sps:$4 sm:$0xff]  }
  0xc7   : > { %936 = vmatprep.mubr.bf16.mxu0 %v477_v15  ;;  %v2594_v27 = vld [vmem:[#allocation7 + $0xc4] ss:$8 sps:$4 sm:$0xff]   ;;  %v2596_v28 = vld [vmem:[#allocation7 + $0xc0] ss:$8 sps:$4 sm:$0xff]   ;;  %v2597_v29 = vld [vmem:[#allocation7 + $0xd4] ss:$8 sps:$4 sm:$0xff]  }
  0xc8   : > { %909 = vmatpush1.bf16.msra.mxu0 %v2566_v5  ;;  %v2599_v30 = vld [vmem:[#allocation7 + $0xd0] ss:$8 sps:$4 sm:$0xff]   ;;  %v2600_v31 = vld [vmem:[#allocation7 + $0xe4] ss:$8 sps:$4 sm:$0xff]   ;;  %v2602_v32 = vld [vmem:[#allocation7 + $0xe0] ss:$8 sps:$4 sm:$0xff]  }
  0xc9   : > { %910 = vmatprep.subr.bf16.mxu0 %v2567_v6  ;;  %v2603_v33 = vld [vmem:[#allocation7 + $0xf4] ss:$8 sps:$4 sm:$0xff]   ;;  %v2605_v34 = vld [vmem:[#allocation7 + $0xf0] ss:$8 sps:$4 sm:$0xff]   ;;  %v412_v35 = vld [vmem:[%s3284_s18] sm:$0xff]  ;;  %s1961_s21 = sshll.u32 %s3567_s19, 4  ;;  %s3626_s21 = int_to_ptr.vmem [resolvable:$true] %s1961_s21 }
  0xca   : > { %v416_v36 = vld [vmem:[%s3284_s18 + $0x20] sm:$0xff]  ;;  %v421_v38 = vld [vmem:[%s3284_s18 + $0x48] sm:$0xff]  ;;  %v2611_v42 = vld [vmem:[#allocation7 + $0x114] ss:$8 sps:$4 sm:$0xff]   ;;  %s1948_s9 = scalar_lea.sflag [#allocation4], %s3270_s26  ;;  %s2894_s20 = scalar_lea.vmem %s3626_s21, 2048 }
  0xcb   : > { %v2608_v37 = vld [vmem:[#allocation7 + $0x104] ss:$8 sps:$4 sm:$0xff]   ;;  %v476_v40 = vpack.c.bf16 %v416_v36, %v412_v35  ;;  %v2606_v41 = vld [vmem:[#allocation7 + $0x100] ss:$8 sps:$4 sm:$0xff]   ;;  %v2609_v45 = vld [vmem:[#allocation7 + $0x110] ss:$8 sps:$4 sm:$0xff]   ;;  %p2895_p2 = scmp.ne.s32.totalorder %s3626_s21, %s2894_s20 }
  0xcc   : > { %911 = vmatpush1.bf16.msra.mxu0 %v2569_v7  ;;  %v425_v39 = vld [vmem:[%s3284_s18 + $0x68] sm:$0xff]  ;;  %v2654_v44 = vld [vmem:[#allocation8 + $0x40] sm:$0xff]   ;;  %v2658_v54 = vld [vmem:[#allocation8 + $0x50] sm:$0xff]  }
  0xcd   : > { %912 = vmatprep.subr.bf16.mxu0 %v2570_v8  ;;  %v481_v43 = vpack.c.bf16 %v425_v39, %v421_v38  ;;  %v420_v46 = vld [vmem:[%s3284_s18 + $0x40] sm:$0xff]  ;;  %v429_v50 = vld [vmem:[%s3284_s18 + $0x88] sm:$0xff]  ;;  %2228 = vmatprep.subr.bf16.mxu1 %v2654_v44  ;;  %v2617_v57 = vld [vmem:[#allocation7 + $0x134] ss:$8 sps:$4 sm:$0xff]   ;;  %p2896_p4 = pnand %p2895_p2, %p3178_p5 }
  0xce   : > { %v424_v47 = vld [vmem:[%s3284_s18 + $0x60] sm:$0xff]  ;;  %v2656_v51 = vld [vmem:[#allocation8 + $0x48] sm:$0xff]   ;;  %v2659_v59 = vld [vmem:[#allocation8 + $0x10] sm:$0xff]  }
  0xcf   : > { %v2655_v48 = vld [vmem:[#allocation8] sm:$0xff]   ;;  %v433_v52 = vld [vmem:[%s3284_s18 + $0xa8] sm:$0xff]  ;;  %v480_v55 = vpack.c.bf16 %v424_v47, %v420_v46  ;;  %v2615_v60 = vld [vmem:[#allocation7 + $0x130] ss:$8 sps:$4 sm:$0xff]   ;;  %p2897_p0 = pneg %p2896_p4 }
  0xd0   : > { %913 = vmatpush1.bf16.msra.mxu0 %v2572_v9  ;;  %v2614_v49 = vld [vmem:[#allocation7 + $0x124] ss:$8 sps:$4 sm:$0xff]   ;;  %2229 = vmatpush3.bf16.msra.mxu1 %v2655_v48  ;;  %v2612_v56 = vld [vmem:[#allocation7 + $0x120] ss:$8 sps:$4 sm:$0xff]   ;;  %v485_v58 = vpack.c.bf16 %v433_v52, %v429_v50  ;;  %v2660_v63 = vld [vmem:[#allocation8 + $0x58] sm:$0xff]  }
  0xd1   : > { %914 = vmatprep.subr.bf16.mxu0 %v2573_v10  ;;  %v2657_v53 = vld [vmem:[#allocation8 + $0x8] sm:$0xff]   ;;  %2230 = vmatprep.subr.bf16.mxu1 %v2656_v51  ;;  %v428_v61 = vld [vmem:[%s3284_s18 + $0x80] sm:$0xff]  ;;  %v2661_v3 = vld [vmem:[#allocation8 + $0x18] sm:$0xff]  }
  0xd2   : > { %v432_v62 = vld [vmem:[%s3284_s18 + $0xa0] sm:$0xff]  ;;  %v437_v1 = vld [vmem:[%s3284_s18 + $0xc8] sm:$0xff]  ;;  %v2623_v7 = vld [vmem:[#allocation7 + $0x154] ss:$8 sps:$4 sm:$0xff]  }
  0xd3   : > { %v2620_v0 = vld [vmem:[#allocation7 + $0x144] ss:$8 sps:$4 sm:$0xff]   ;;  %v2618_v5 = vld [vmem:[#allocation7 + $0x140] ss:$8 sps:$4 sm:$0xff]   ;;  %v484_v6 = vpack.c.bf16 %v432_v62, %v428_v61  ;;  %v2647_v50 = vld [vmem:[#allocation7 + $0x1d4] ss:$8 sps:$4 sm:$0xff]  }
  0xd4   : > { %915 = vmatpush1.bf16.msra.mxu0 %v2575_v11  ;;  %2231 = vmatpush3.bf16.msra.mxu1 %v2657_v53  ;;  %v441_v2 = vld [vmem:[%s3284_s18 + $0xe8] sm:$0xff]  ;;  %v2662_v4 = vld [vmem:[#allocation8 + $0x60] sm:$0xff]   ;;  %v2621_v11 = vld [vmem:[#allocation7 + $0x150] ss:$8 sps:$4 sm:$0xff]  }
  0xd5   : > { %916 = vmatprep.subr.bf16.mxu0 %v2576_v12  ;;  %2232 = vmatprep.subr.bf16.mxu1 %v2658_v54  ;;  %v2663_v8 = vld [vmem:[#allocation8 + $0x20] sm:$0xff]   ;;  %v489_v9 = vpack.c.bf16 %v441_v2, %v437_v1  ;;  %v2664_v10 = vld [vmem:[#allocation8 + $0x68] sm:$0xff]   ;;  %v2645_v51 = vld [vmem:[#allocation7 + $0x1d0] ss:$8 sps:$4 sm:$0xff]  }
  0xd6   : > { %v436_v12 = vld [vmem:[%s3284_s18 + $0xc0] sm:$0xff]  ;;  %v445_v15 = vld [vmem:[%s3284_s18 + $0x108] sm:$0xff]  ;;  %v2651_v61 = vld [vmem:[#allocation7 + $0x1f0] ss:$8 sps:$4 sm:$0xff]  }
  0xd7   : > { %v440_v13 = vld [vmem:[%s3284_s18 + $0xe0] sm:$0xff]  ;;  %v461_v35 = vld [vmem:[%s3284_s18 + $0x188] sm:$0xff]  ;;  %v414_v62 = vld [vmem:[%s3284_s18 + $0x10] sm:$0xff] }
  0xd8   : > { %917 = vmatpush1.bf16.msra.mxu0 %v2578_v16  ;;  %2233 = vmatpush3.bf16.msra.mxu1 %v2659_v59  ;;  %v2626_v14 = vld [vmem:[#allocation7 + $0x164] ss:$8 sps:$4 sm:$0xff]   ;;  %v2636_v38 = vld [vmem:[#allocation7 + $0x1a0] ss:$8 sps:$4 sm:$0xff]   ;;  %v427_v1 = vld [vmem:[%s3284_s18 + $0x78] sm:$0xff] }
  0xd9   : > { %918 = vmatprep.subr.bf16.mxu0 %v2579_v17  ;;  %2234 = vmatprep.subr.bf16.mxu1 %v2660_v63  ;;  %v449_v16 = vld [vmem:[%s3284_s18 + $0x128] sm:$0xff]  ;;  %v468_v52 = vld [vmem:[%s3284_s18 + $0x1c0] sm:$0xff]  ;;  %v418_v63 = vld [vmem:[%s3284_s18 + $0x30] sm:$0xff] }
  0xda   : > { %v2624_v17 = vld [vmem:[#allocation7 + $0x160] ss:$8 sps:$4 sm:$0xff]   ;;  %v2644_v44 = vld [vmem:[#allocation7 + $0x1c4] ss:$8 sps:$4 sm:$0xff]   ;;  %v478_v2 = vpack.c.bf16 %v418_v63, %v414_v62 }
  0xdb   : > { %v465_v36 = vld [vmem:[%s3284_s18 + $0x1a8] sm:$0xff]  ;;  %v472_v53 = vld [vmem:[%s3284_s18 + $0x1e0] sm:$0xff] }
  0xdc   : > { %919 = vmatpush1.bf16.msra.mxu0 %v2581_v18  ;;  %2235 = vmatpush3.bf16.msra.mxu1 %v2661_v3  ;;  %v488_v18 = vpack.c.bf16 %v440_v13, %v436_v12  ;;  %v501_v39 = vpack.c.bf16 %v465_v36, %v461_v35  ;;  %v473_v46 = vld [vmem:[%s3284_s18 + $0x1e8] sm:$0xff]  ;;  %v439_v12 = vld [vmem:[%s3284_s18 + $0xd8] sm:$0xff]  ;;  %v466_v35 = vld [vmem:[%s3284_s18 + $0x1b0] sm:$0xff] }
  0xdd   : > { %920 = vmatprep.subr.bf16.mxu0 %v2582_v19  ;;  %2236 = vmatprep.subr.bf16.mxu1 %v2662_v4  ;;  %v2629_v19 = vld [vmem:[#allocation7 + $0x174] ss:$8 sps:$4 sm:$0xff]   ;;  %v2642_v48 = vld [vmem:[#allocation7 + $0x1c0] ss:$8 sps:$4 sm:$0xff]   ;;  %v2650_v54 = vld [vmem:[#allocation7 + $0x1e4] ss:$8 sps:$4 sm:$0xff]  }
  0xde   : > { %v422_v4 = vld [vmem:[%s3284_s18 + $0x50] sm:$0xff]  ;;  %v443_v13 = vld [vmem:[%s3284_s18 + $0xf8] sm:$0xff] }
  0xdf   : > { %v471_v36 = vld [vmem:[%s3284_s18 + $0x1d8] sm:$0xff] }
  0xe0   : > { %921 = vmatpush1.bf16.msra.mxu0 %v2584_v20  ;;  %2237 = vmatpush3.bf16.msra.mxu1 %v2663_v8  ;;  %v493_v20 = vpack.c.bf16 %v449_v16, %v445_v15  ;;  %v491_v15 = vpack.c.bf16 %v443_v13, %v439_v12  ;;  %v438_v16 = vld [vmem:[%s3284_s18 + $0xd0] sm:$0xff] }
  0xe1   : > { %922 = vmatprep.subr.bf16.mxu0 %v2585_v21  ;;  %2238 = vmatprep.subr.bf16.mxu1 %v2664_v10  ;;  %v2627_v21 = vld [vmem:[#allocation7 + $0x170] ss:$8 sps:$4 sm:$0xff]  }
  0xe2   : > { %v430_v10 = vld [vmem:[%s3284_s18 + $0x90] sm:$0xff] }
  0xe4   : > { %923 = vmatpush1.bf16.msra.mxu0 %v2587_v22  ;;  %v444_v22 = vld [vmem:[%s3284_s18 + $0x100] sm:$0xff] }
  0xe5   : > { %924 = vmatprep.subr.bf16.mxu0 %v2588_v23  ;;  %v448_v23 = vld [vmem:[%s3284_s18 + $0x120] sm:$0xff] }
  0xe8   : > { %925 = vmatpush1.bf16.msra.mxu0 %v2590_v24  ;;  %v2632_v24 = vld [vmem:[#allocation7 + $0x184] ss:$8 sps:$4 sm:$0xff]  }
  0xe9   : > { %926 = vmatprep.subr.bf16.mxu0 %v2591_v25  ;;  %v453_v25 = vld [vmem:[%s3284_s18 + $0x148] sm:$0xff] }
  0xec   : > { %927 = vmatpush1.bf16.msra.mxu0 %v2593_v26  ;;  %v457_v26 = vld [vmem:[%s3284_s18 + $0x168] sm:$0xff] }
  0xed   : > { %928 = vmatprep.subr.bf16.mxu0 %v2594_v27  ;;  %v492_v27 = vpack.c.bf16 %v448_v23, %v444_v22  ;;  %v446_v22 = vld [vmem:[%s3284_s18 + $0x110] sm:$0xff] }
  0xee   : > { %v450_v23 = vld [vmem:[%s3284_s18 + $0x130] sm:$0xff] }
  0xf0   : > { %929 = vmatpush1.bf16.msra.mxu0 %v2596_v28  ;;  %v2630_v28 = vld [vmem:[#allocation7 + $0x180] ss:$8 sps:$4 sm:$0xff]  }
  0xf1   : > { %930 = vmatprep.subr.bf16.mxu0 %v2597_v29  ;;  %v497_v29 = vpack.c.bf16 %v457_v26, %v453_v25  ;;  %v459_v25 = vld [vmem:[%s3284_s18 + $0x178] sm:$0xff]  ;;  %v494_v26 = vpack.c.bf16 %v450_v23, %v446_v22 }
  0xf4   : > { %931 = vmatpush1.bf16.msra.mxu0 %v2599_v30  ;;  %v2635_v30 = vld [vmem:[#allocation7 + $0x194] ss:$8 sps:$4 sm:$0xff]  }
  0xf5   : > { %932 = vmatprep.subr.bf16.mxu0 %v2600_v31  ;;  %v2633_v31 = vld [vmem:[#allocation7 + $0x190] ss:$8 sps:$4 sm:$0xff]  }
  0xf8   : > { %933 = vmatpush1.bf16.msra.mxu0 %v2602_v32  ;;  %v452_v32 = vld [vmem:[%s3284_s18 + $0x140] sm:$0xff] }
  0xf9   : > { %934 = vmatprep.subr.bf16.mxu0 %v2603_v33  ;;  %v456_v33 = vld [vmem:[%s3284_s18 + $0x160] sm:$0xff] }
  0xfc   : > { %935 = vmatpush1.bf16.msra.mxu0 %v2605_v34  ;;  %v2638_v34 = vld [vmem:[#allocation7 + $0x1a4] ss:$8 sps:$4 sm:$0xff]  }
  0xfd   : > { %1017 = vmatprep.subr.bf16.mxu0 %v2608_v37  ;;  %v496_v37 = vpack.c.bf16 %v456_v33, %v452_v32 }
  0xff   : > { %937 = vmatmul.mubr.bf16.vlgmr.msra.gmra.mrb[0].mxu0 %v476_v40  ;;  %v2641_v40 = vld [vmem:[#allocation7 + $0x1b4] ss:$8 sps:$4 sm:$0xff]  }
 0x100   : > { %1018 = vmatpush1.bf16.msra.mxu0 %v2606_v41  ;;  %946 = vmatprep.mubr.bf16.mxu0 %v481_v43  ;;  %v2639_v41 = vld [vmem:[#allocation7 + $0x1b0] ss:$8 sps:$4 sm:$0xff]   ;;  %v464_v43 = vld [vmem:[%s3284_s18 + $0x1a0] sm:$0xff] }
 0x101   : > { %1019 = vmatprep.subr.bf16.mxu0 %v2611_v42  ;;  %v460_v42 = vld [vmem:[%s3284_s18 + $0x180] sm:$0xff] }
 0x102   : > { %v500_v47 = vpack.c.bf16 %v464_v43, %v460_v42  ;;  %v2665_v43 = vld [vmem:[#allocation8 + $0x28] sm:$0xff]  }
 0x103   : > { %2239 = vmatpush3.bf16.msra.mxu1 %v2665_v43 }
 0x104   : > { %1020 = vmatpush1.bf16.msra.mxu0 %v2609_v45  ;;  %v469_v45 = vld [vmem:[%s3284_s18 + $0x1c8] sm:$0xff] }
 0x105   : > { %1021 = vmatprep.subr.bf16.mxu0 %v2614_v49  ;;  %v505_v49 = vpack.c.bf16 %v473_v46, %v469_v45  ;;  %v2667_v45 = vld [vmem:[#allocation8 + $0x30] sm:$0xff]   ;;  %v2668_v46 = vld [vmem:[#allocation8 + $0x78] sm:$0xff]  }
 0x107   : > { %947 = vmatmul.mubr.bf16.gmra.mrb[4].mxu0 %v480_v55  ;;  %v415_v55 = vld [vmem:[%s3284_s18 + $0x18] sm:$0xff] }
 0x108   : > { %1022 = vmatpush1.bf16.msra.mxu0 %v2612_v56  ;;  %956 = vmatprep.mubr.bf16.mxu0 %v485_v58  ;;  %v419_v56 = vld [vmem:[%s3284_s18 + $0x38] sm:$0xff]  ;;  %v2648_v58 = vld [vmem:[#allocation7 + $0x1e0] ss:$8 sps:$4 sm:$0xff]  }
 0x109   : > { %1023 = vmatprep.subr.bf16.mxu0 %v2617_v57  ;;  %v504_v57 = vpack.c.bf16 %v472_v53, %v468_v52  ;;  %v479_v59 = vpack.c.bf16 %v419_v56, %v415_v55  ;;  %v572_v52 = vld [vmem:[%s3677_s3] sm:$0x3] }
 0x10c   : > { %1024 = vmatpush1.bf16.msra.mxu0 %v2615_v60  ;;  %v2653_v60 = vld [vmem:[#allocation7 + $0x1f4] ss:$8 sps:$4 sm:$0xff]  }
 0x10d   : > { %1025 = vmatprep.subr.bf16.mxu0 %v2620_v0  ;;  %v423_v0 = vld [vmem:[%s3284_s18 + $0x58] sm:$0xff] }
 0x10e   : > { %v483_v3 = vpack.c.bf16 %v427_v1, %v423_v0 }
 0x10f   : > { %957 = vmatmul.mubr.bf16.gmra.mrb[8].mxu0 %v484_v6  ;;  %v431_v6 = vld [vmem:[%s3284_s18 + $0x98] sm:$0xff] }
 0x110   : > { %1026 = vmatpush1.bf16.msra.mxu0 %v2618_v5  ;;  %966 = vmatprep.mubr.bf16.mxu0 %v489_v9  ;;  %v426_v5 = vld [vmem:[%s3284_s18 + $0x70] sm:$0xff] }
 0x111   : > { %1027 = vmatprep.subr.bf16.mxu0 %v2623_v7  ;;  %v435_v7 = vld [vmem:[%s3284_s18 + $0xb8] sm:$0xff]  ;;  %v482_v8 = vpack.c.bf16 %v426_v5, %v422_v4 }
 0x112   : > { %v487_v9 = vpack.c.bf16 %v435_v7, %v431_v6 }
 0x114   : > { %1028 = vmatpush1.bf16.msra.mxu0 %v2621_v11  ;;  %v434_v11 = vld [vmem:[%s3284_s18 + $0xb0] sm:$0xff] }
 0x115   : > { %1029 = vmatprep.subr.bf16.mxu0 %v2626_v14  ;;  %v486_v14 = vpack.c.bf16 %v434_v11, %v430_v10 }
 0x117   : > { %967 = vmatmul.mubr.bf16.gmra.mrb[12].mxu0 %v488_v18  ;;  %v447_v18 = vld [vmem:[%s3284_s18 + $0x118] sm:$0xff] }
 0x118   : > { %1030 = vmatpush1.bf16.msra.mxu0 %v2624_v17  ;;  %976 = vmatprep.mubr.bf16.mxu0 %v493_v20  ;;  %v442_v17 = vld [vmem:[%s3284_s18 + $0xf0] sm:$0xff] }
 0x119   : > { %1031 = vmatprep.subr.bf16.mxu0 %v2629_v19  ;;  %v451_v19 = vld [vmem:[%s3284_s18 + $0x138] sm:$0xff]  ;;  %v490_v20 = vpack.c.bf16 %v442_v17, %v438_v16  ;;  %v2672_v17 = vld [vmem:[#allocation10 + $0x50] sm:$0xff]  }
 0x11c   : > { %1032 = vmatpush1.bf16.msra.mxu0 %v2627_v21  ;;  %v495_v21 = vpack.c.bf16 %v451_v19, %v447_v18 }
 0x11d   : > { %1033 = vmatprep.subr.bf16.mxu0 %v2632_v24  ;;  %v455_v24 = vld [vmem:[%s3284_s18 + $0x158] sm:$0xff] }
 0x11f   : > { %977 = vmatmul.mubr.bf16.gmra.mrb[16].mxu0 %v492_v27  ;;  %v499_v27 = vpack.c.bf16 %v459_v25, %v455_v24  ;;  %v2673_v25 = vld [vmem:[#allocation10 + $0x58] sm:$0xff]  }
 0x120   : > { %1034 = vmatpush1.bf16.msra.mxu0 %v2630_v28  ;;  %986 = vmatprep.mubr.bf16.mxu0 %v497_v29  ;;  %v454_v28 = vld [vmem:[%s3284_s18 + $0x150] sm:$0xff] }
 0x121   : > { %1035 = vmatprep.subr.bf16.mxu0 %v2635_v30  ;;  %v458_v29 = vld [vmem:[%s3284_s18 + $0x170] sm:$0xff]  ;;  %v463_v30 = vld [vmem:[%s3284_s18 + $0x198] sm:$0xff] }
 0x122   : > { %v498_v32 = vpack.c.bf16 %v458_v29, %v454_v28 }
 0x124   : > { %1036 = vmatpush1.bf16.msra.mxu0 %v2633_v31  ;;  %v467_v31 = vld [vmem:[%s3284_s18 + $0x1b8] sm:$0xff] }
 0x125   : > { %1037 = vmatprep.subr.bf16.mxu0 %v2638_v34  ;;  %v503_v33 = vpack.c.bf16 %v467_v31, %v463_v30  ;;  %v462_v34 = vld [vmem:[%s3284_s18 + $0x190] sm:$0xff] }
 0x127   : > { %987 = vmatmul.mubr.bf16.gmra.mrb[20].mxu0 %v496_v37  ;;  %v475_v37 = vld [vmem:[%s3284_s18 + $0x1f8] sm:$0xff] }
 0x128   : > { %1038 = vmatpush1.bf16.msra.mxu0 %v2636_v38  ;;  %996 = vmatprep.mubr.bf16.mxu0 %v501_v39  ;;  %v502_v38 = vpack.c.bf16 %v466_v35, %v462_v34  ;;  %v507_v39 = vpack.c.bf16 %v475_v37, %v471_v36 }
 0x129   : > { %1039 = vmatprep.subr.bf16.mxu0 %v2641_v40  ;;  %v470_v40 = vld [vmem:[%s3284_s18 + $0x1d0] sm:$0xff] }
 0x12c   : > { %1040 = vmatpush1.bf16.msra.mxu0 %v2639_v41  ;;  %v474_v41 = vld [vmem:[%s3284_s18 + $0x1f0] sm:$0xff] }
 0x12d   : > { %1041 = vmatprep.subr.bf16.mxu0 %v2644_v44  ;;  %v506_v42 = vpack.c.bf16 %v474_v41, %v470_v40  ;;  %v2666_v44 = vld [vmem:[#allocation8 + $0x70] sm:$0xff]  }
 0x12e   : > { %2240 = vmatprep.subr.bf16.mxu1 %v2666_v44 }
 0x12f   : > { %997 = vmatmul.mubr.bf16.gmra.mrb[24].mxu0 %v500_v47  ;;  %2241 = vmatpush3.bf16.msra.mxu1 %v2667_v45  ;;  %v2669_v47 = vld [vmem:[#allocation8 + $0x38] sm:$0xff]  }
 0x130   : > { %1042 = vmatpush1.bf16.msra.mxu0 %v2642_v48  ;;  %1006 = vmatprep.mubr.bf16.mxu0 %v505_v49  ;;  %v2670_v48 = vld [vmem:[#allocation10 + $0x40] sm:$0xff]   ;;  %v574_v49 = vlaneseq }
 0x131   : > { %1043 = vmatprep.subr.bf16.mxu0 %v2647_v50  ;;  %2242 = vmatprep.subr.bf16.mxu1 %v2668_v46 }
 0x132   : > { %v575_v50 = vshrl.u32 %v574_v49, 7 }
 0x133   : > { %2243 = vmatpush3.bf16.msra.mxu1 %v2669_v47 }
 0x134   : > { %1044 = vmatpush1.bf16.msra.mxu0 %v2645_v51  ;;  %2324 = vmatprep.subr.bf16.mxu1 %v2670_v48  ;;  %v576_v51 = vsub.s32 0, %v575_v50  ;;  %v580_v53 = vsub.s32 1, %v575_v50 }
 0x135   : > { %1045 = vmatprep.subr.bf16.mxu0 %v2650_v54 }
 0x136   : > { %v3365_v54 = vrot.slane %v572_v52, %v576_v51  ;;  %v3367_v55 = vrot.slane %v572_v52, %v580_v53 }
 0x137   : > { %1007 = vmatmul.mubr.bf16.gmra.mrb[28].mxu0 %v504_v57 }
 0x138   : > { %1046 = vmatpush1.bf16.msra.mxu0 %v2648_v58  ;;  %1049 = vmatprep.mubr.bf16.mxu0 %v479_v59 }
 0x139   : > { %1047 = vmatprep.subr.bf16.mxu0 %v2653_v60 }
 0x13c   : > { %1048 = vmatpush1.bf16.msra.mxu0 %v2651_v61 }
 0x13f   : > { %1050 = vmatmul.mubr.bf16.vlgmr.msra.gmra.mrb[0].mxu0 %v478_v2 }
 0x140   : > { %1059 = vmatprep.mubr.bf16.mxu0 %v483_v3 }
 0x147   : > { %1060 = vmatmul.mubr.bf16.gmra.mrb[4].mxu0 %v482_v8 }
 0x148   : > { %1069 = vmatprep.mubr.bf16.mxu0 %v487_v9  ;;  %v2671_v9 = vld [vmem:[#allocation10 + $0x48] sm:$0xff]  }
 0x14f   : > { %1070 = vmatmul.mubr.bf16.gmra.mrb[8].mxu0 %v486_v14 }
 0x150   : > { %1079 = vmatprep.mubr.bf16.mxu0 %v491_v15 }
 0x157   : > { %1080 = vmatmul.mubr.bf16.gmra.mrb[12].mxu0 %v490_v20 }
 0x158   : > { %1089 = vmatprep.mubr.bf16.mxu0 %v495_v21 }
 0x15f   : > { %1090 = vmatmul.mubr.bf16.gmra.mrb[16].mxu0 %v494_v26 }
 0x160   : > { %1099 = vmatprep.mubr.bf16.mxu0 %v499_v27 }
 0x167   : > { %1100 = vmatmul.mubr.bf16.gmra.mrb[20].mxu0 %v498_v32 }
 0x168   : > { %1109 = vmatprep.mubr.bf16.mxu0 %v503_v33 }
 0x16f   : > { %1110 = vmatmul.mubr.bf16.gmra.mrb[24].mxu0 %v502_v38 }
 0x170   : > { %1119 = vmatprep.mubr.bf16.mxu0 %v507_v39 }
 0x177   : > { %1120 = vmatmul.mubr.bf16.gmra.mrb[28].mxu0 %v506_v42 }
 0x212   : > { %v1051_v56 = vpop.f32.mrb[0].mxu0 }
 0x213   : > { %v2388_v57 = vadd.f32 %v1051_v56, %v3365_v54  ;;  %v1053_v58 = vpop.f32.mrb[1].mxu0 }
 0x214   : > { %v2389_v59 = vadd.f32 %v1053_v58, %v3367_v55  ;;  %v1055_v60 = vpop.f32.mrb[2].mxu0 }
 0x215   : > { %v2390_v61 = vadd.f32 %v1055_v60, %v3365_v54  ;;  %v1057_v62 = vpop.f32.mrb[3].mxu0  ;;  %v1130_v0 = vmax.f32 %v2388_v57, 0.0 }
 0x216   : > { %v2391_v63 = vadd.f32 %v1057_v62, %v3367_v55  ;;  %v1131_v2 = vmax.f32 %v2389_v59, 0.0 }
 0x217   : > { %v1132_v1 = vmax.f32 %v2390_v61, 0.0 }
 0x218   : > { %v1133_v3 = vmax.f32 %v2391_v63, 0.0 }
 0x219   : > { %v1162_v4 = vpack.c.bf16 %v1132_v1, %v1130_v0 }
 0x21a   : > { %v1061_v5 = vpop.f32.mrb[4].mxu0  ;;  %v1163_v6 = vpack.c.bf16 %v1133_v3, %v1131_v2 }
 0x21b   : > { %v2392_v7 = vadd.f32 %v1061_v5, %v3365_v54  ;;  %v1063_v8 = vpop.f32.mrb[5].mxu0 }
 0x21c   : > { %v2393_v10 = vadd.f32 %v1063_v8, %v3367_v55  ;;  %v1065_v11 = vpop.f32.mrb[6].mxu0  ;;  %1345 = vmatprep.mubr.bf16.mxu1 %v1163_v6 }
 0x21d   : > { %v2394_v12 = vadd.f32 %v1065_v11, %v3365_v54  ;;  %v1067_v13 = vpop.f32.mrb[7].mxu0  ;;  %1346 = vmatmul.mubr.bf16.vlgmr.msra.gmra.mrb[0].mxu1 %v1162_v4  ;;  %v1134_v15 = vmax.f32 %v2392_v7, 0.0 }
 0x21e   : > { %v2395_v14 = vadd.f32 %v1067_v13, %v3367_v55  ;;  %2325 = vmatpush3.bf16.msra.mxu1 %v2670_v48  ;;  %v1135_v18 = vmax.f32 %v2393_v10, 0.0 }
 0x21f   : > { %v1136_v16 = vmax.f32 %v2394_v12, 0.0  ;;  %2326 = vmatprep.subr.bf16.mxu1 %v2671_v9 }
 0x220   : > { %v1137_v19 = vmax.f32 %v2395_v14, 0.0 }
 0x221   : > { %v1164_v20 = vpack.c.bf16 %v1136_v16, %v1134_v15 }
 0x222   : > { %v1165_v21 = vpack.c.bf16 %v1137_v19, %v1135_v18  ;;  %v1071_v22 = vpop.f32.mrb[8].mxu0  ;;  %2327 = vmatpush3.bf16.msra.mxu1 %v2671_v9 }
 0x223   : > { %v2396_v23 = vadd.f32 %v1071_v22, %v3365_v54  ;;  %v1073_v24 = vpop.f32.mrb[9].mxu0  ;;  %2328 = vmatprep.subr.bf16.mxu1 %v2672_v17 }
 0x224   : > { %v2397_v26 = vadd.f32 %v1073_v24, %v3367_v55  ;;  %v1075_v27 = vpop.f32.mrb[10].mxu0  ;;  %1353 = vmatprep.mubr.bf16.mxu1 %v1165_v21 }
 0x225   : > { %v2398_v28 = vadd.f32 %v1075_v27, %v3365_v54  ;;  %v1077_v29 = vpop.f32.mrb[11].mxu0  ;;  %1354 = vmatmul.mubr.bf16.gmra.mrb[4].mxu1 %v1164_v20  ;;  %v1138_v31 = vmax.f32 %v2396_v23, 0.0 }
 0x226   : > { %v2399_v30 = vadd.f32 %v1077_v29, %v3367_v55  ;;  %2329 = vmatpush3.bf16.msra.mxu1 %v2672_v17  ;;  %v1139_v33 = vmax.f32 %v2397_v26, 0.0 }
 0x227   : > { %v1140_v32 = vmax.f32 %v2398_v28, 0.0  ;;  %2330 = vmatprep.subr.bf16.mxu1 %v2673_v25 }
 0x228   : > { %v1141_v34 = vmax.f32 %v2399_v30, 0.0 }
 0x229   : > { %v1166_v35 = vpack.c.bf16 %v1140_v32, %v1138_v31 }
 0x22a   : > { %v1167_v36 = vpack.c.bf16 %v1141_v34, %v1139_v33  ;;  %v1081_v37 = vpop.f32.mrb[12].mxu0  ;;  %2331 = vmatpush3.bf16.msra.mxu1 %v2673_v25 }
 0x22b   : > { %v2400_v38 = vadd.f32 %v1081_v37, %v3365_v54  ;;  %v1083_v39 = vpop.f32.mrb[13].mxu0 }
 0x22c   : > { %v2401_v40 = vadd.f32 %v1083_v39, %v3367_v55  ;;  %v1085_v41 = vpop.f32.mrb[14].mxu0  ;;  %1361 = vmatprep.mubr.bf16.mxu1 %v1167_v36 }
 0x22d   : > { %v2402_v42 = vadd.f32 %v1085_v41, %v3365_v54  ;;  %v1087_v43 = vpop.f32.mrb[15].mxu0  ;;  %1362 = vmatmul.mubr.bf16.gmra.mrb[8].mxu1 %v1166_v35  ;;  %v1142_v45 = vmax.f32 %v2400_v38, 0.0 }
 0x22e   : > { %v2403_v44 = vadd.f32 %v1087_v43, %v3367_v55  ;;  %v1143_v47 = vmax.f32 %v2401_v40, 0.0 }
 0x22f   : > { %v1144_v46 = vmax.f32 %v2402_v42, 0.0 }
 0x230   : > { %v1145_v48 = vmax.f32 %v2403_v44, 0.0 }
 0x231   : > { %v1168_v49 = vpack.c.bf16 %v1144_v46, %v1142_v45  ;;  %v2674_v45 = vld [vmem:[#allocation10 + $0x60] sm:$0xff]   ;;  %v2675_v46 = vld [vmem:[#allocation10 + $0x68] sm:$0xff]  }
 0x232   : > { %v1169_v50 = vpack.c.bf16 %v1145_v48, %v1143_v47  ;;  %v1091_v51 = vpop.f32.mrb[16].mxu0  ;;  %2332 = vmatprep.subr.bf16.mxu1 %v2674_v45  ;;  %v2676_v47 = vld [vmem:[#allocation10 + $0x70] sm:$0xff]  }
 0x233   : > { %v2404_v52 = vadd.f32 %v1091_v51, %v3365_v54  ;;  %v1093_v53 = vpop.f32.mrb[17].mxu0  ;;  %2333 = vmatpush3.bf16.msra.mxu1 %v2674_v45 }
 0x234   : > { %v2405_v56 = vadd.f32 %v1093_v53, %v3367_v55  ;;  %v1095_v57 = vpop.f32.mrb[18].mxu0  ;;  %1369 = vmatprep.mubr.bf16.mxu1 %v1169_v50  ;;  %2334 = vmatprep.subr.bf16.mxu1 %v2675_v46 }
 0x235   : > { %v2406_v58 = vadd.f32 %v1095_v57, %v3365_v54  ;;  %v1097_v59 = vpop.f32.mrb[19].mxu0  ;;  %1370 = vmatmul.mubr.bf16.gmra.mrb[12].mxu1 %v1168_v49  ;;  %v1146_v61 = vmax.f32 %v2404_v52, 0.0  ;;  %v3404_v52 = vld [vmem:[%s3679_s5] ss:$0 sm:$0xff] }
 0x236   : > { %v2407_v60 = vadd.f32 %v1097_v59, %v3367_v55  ;;  %v1147_v63 = vmax.f32 %v2405_v56, 0.0 }
 0x237   : > { %v1148_v62 = vmax.f32 %v2406_v58, 0.0  ;;  %2335 = vmatpush3.bf16.msra.mxu1 %v2675_v46 }
 0x238   : > { %v1149_v0 = vmax.f32 %v2407_v60, 0.0  ;;  %2336 = vmatprep.subr.bf16.mxu1 %v2676_v47 }
 0x239   : > { %v1170_v1 = vpack.c.bf16 %v1148_v62, %v1146_v61 }
 0x23a   : > { %v1171_v2 = vpack.c.bf16 %v1149_v0, %v1147_v63  ;;  %v1101_v3 = vpop.f32.mrb[20].mxu0 }
 0x23b   : > { %v2408_v4 = vadd.f32 %v1101_v3, %v3365_v54  ;;  %v1103_v5 = vpop.f32.mrb[21].mxu0  ;;  %2337 = vmatpush3.bf16.msra.mxu1 %v2676_v47 }
 0x23c   : > { %v2409_v6 = vadd.f32 %v1103_v5, %v3367_v55  ;;  %v1105_v7 = vpop.f32.mrb[22].mxu0  ;;  %1377 = vmatprep.mubr.bf16.mxu1 %v1171_v2 }
 0x23d   : > { %v2410_v8 = vadd.f32 %v1105_v7, %v3365_v54  ;;  %v1107_v9 = vpop.f32.mrb[23].mxu0  ;;  %1378 = vmatmul.mubr.bf16.gmra.mrb[16].mxu1 %v1170_v1  ;;  %v1150_v11 = vmax.f32 %v2408_v4, 0.0 }
 0x23e   : > { %v2411_v10 = vadd.f32 %v1107_v9, %v3367_v55  ;;  %v1151_v13 = vmax.f32 %v2409_v6, 0.0  ;;  %v2679_v6 = vld [vmem:[#allocation10 + $0x8] sm:$0xff]  }
 0x23f   : > { %v1152_v12 = vmax.f32 %v2410_v8, 0.0 }
 0x240   : > { %v1153_v14 = vmax.f32 %v2411_v10, 0.0 }
 0x241   : > { %v1172_v15 = vpack.c.bf16 %v1152_v12, %v1150_v11  ;;  %v2680_v12 = vld [vmem:[#allocation10 + $0x10] sm:$0xff]  }
 0x242   : > { %v1173_v16 = vpack.c.bf16 %v1153_v14, %v1151_v13  ;;  %v1111_v17 = vpop.f32.mrb[24].mxu0 }
 0x243   : > { %v2412_v18 = vadd.f32 %v1111_v17, %v3365_v54  ;;  %v1113_v19 = vpop.f32.mrb[25].mxu0  ;;  %v2681_v17 = vld [vmem:[#allocation10 + $0x18] sm:$0xff]  }
 0x244   : > { %v2413_v20 = vadd.f32 %v1113_v19, %v3367_v55  ;;  %v1115_v21 = vpop.f32.mrb[26].mxu0  ;;  %1385 = vmatprep.mubr.bf16.mxu1 %v1173_v16 }
 0x245   : > { %v2414_v22 = vadd.f32 %v1115_v21, %v3365_v54  ;;  %v1117_v23 = vpop.f32.mrb[27].mxu0  ;;  %1386 = vmatmul.mubr.bf16.gmra.mrb[20].mxu1 %v1172_v15  ;;  %v1154_v25 = vmax.f32 %v2412_v18, 0.0 }
 0x246   : > { %v2415_v24 = vadd.f32 %v1117_v23, %v3367_v55  ;;  %v1155_v27 = vmax.f32 %v2413_v20, 0.0  ;;  %v2682_v23 = vld [vmem:[#allocation10 + $0x20] sm:$0xff]  }
 0x247   : > { %v1156_v26 = vmax.f32 %v2414_v22, 0.0 }
 0x248   : > { %v1157_v28 = vmax.f32 %v2415_v24, 0.0 }
 0x249   : > { %v1174_v29 = vpack.c.bf16 %v1156_v26, %v1154_v25 }
 0x24a   : > { %v1175_v30 = vpack.c.bf16 %v1157_v28, %v1155_v27  ;;  %v1121_v31 = vpop.f32.mrb[28].mxu0  ;;  %v2683_v28 = vld [vmem:[#allocation10 + $0x28] sm:$0xff]  }
 0x24b   : > { %v2416_v32 = vadd.f32 %v1121_v31, %v3365_v54  ;;  %v1123_v33 = vpop.f32.mrb[29].mxu0 }
 0x24c   : > { %v2417_v34 = vadd.f32 %v1123_v33, %v3367_v55  ;;  %v1125_v35 = vpop.f32.mrb[30].mxu0  ;;  %1393 = vmatprep.mubr.bf16.mxu1 %v1175_v30 }
 0x24d   : > { %v2418_v36 = vadd.f32 %v1125_v35, %v3365_v54  ;;  %v1127_v37 = vpop.f32.mrb[31].mxu0  ;;  %1394 = vmatmul.mubr.bf16.gmra.mrb[24].mxu1 %v1174_v29  ;;  %v1158_v39 = vmax.f32 %v2416_v32, 0.0  ;;  %v2677_v54 = vld [vmem:[#allocation10 + $0x78] sm:$0xff]  }
 0x24e   : > { %v2419_v38 = vadd.f32 %v1127_v37, %v3367_v55  ;;  %v1159_v41 = vmax.f32 %v2417_v34, 0.0  ;;  %2338 = vmatprep.subr.bf16.mxu1 %v2677_v54  ;;  %v2678_v55 = vld [vmem:[#allocation10] sm:$0xff]   ;;  %v2684_v34 = vld [vmem:[#allocation10 + $0x30] sm:$0xff]  }
 0x24f   : > { %v1160_v40 = vmax.f32 %v2418_v36, 0.0  ;;  %2339 = vmatpush3.bf16.msra.mxu1 %v2677_v54 }
 0x250   : > { %v1161_v42 = vmax.f32 %v2419_v38, 0.0  ;;  %2356 = vmatprep.subr.bf16.mxu1 %v2678_v55 }
 0x251   : > { %v1176_v43 = vpack.c.bf16 %v1160_v40, %v1158_v39  ;;  %v2685_v39 = vld [vmem:[#allocation10 + $0x38] sm:$0xff]  }
 0x252   : > { %v1177_v44 = vpack.c.bf16 %v1161_v42, %v1159_v41 }
 0x254   : > { %1401 = vmatprep.mubr.bf16.mxu1 %v1177_v44 }
 0x255   : > { %1402 = vmatmul.mubr.bf16.gmra.mrb[28].mxu1 %v1176_v43 }
 0x2f0   : > { %v2244_v48 = vpop.f32.mrb[0].mxu1 }
 0x2f1   : > { %v2245_v49 = vpop.f32.mrb[1].mxu1 }
 0x2f2   : > { %v2246_v50 = vadd.f32 %v2245_v49, %v2244_v48  ;;  %v2247_v51 = vpop.f32.mrb[2].mxu1 }
 0x2f3   : > { %v2248_v53 = vpop.f32.mrb[3].mxu1 }
 0x2f4   : > { %v2249_v56 = vadd.f32 %v2248_v53, %v2247_v51  ;;  %v3407_v57 = vadd.f32 %v2246_v50, %v3404_v52 }
 0x2f6   : > { %v3410_v58 = vadd.f32 %v2249_v56, %v3404_v52 }
 0x2f8   : > { %v2250_v59 = vpop.f32.mrb[4].mxu1  ;;  %v1466_v60 = vpack.c.bf16 %v3410_v58, %v3407_v57 }
 0x2f9   : > { %v2251_v61 = vpop.f32.mrb[5].mxu1 }
 0x2fa   : > { %v2252_v62 = vadd.f32 %v2251_v61, %v2250_v59  ;;  %v2253_v63 = vpop.f32.mrb[6].mxu1  ;;  %2340 = vmatprep.mubr.bf16.mxu1 %v1466_v60 }
 0x2fb   : > { %v2254_v0 = vpop.f32.mrb[7].mxu1 }
 0x2fc   : > { %v2255_v1 = vadd.f32 %v2254_v0, %v2253_v63  ;;  %v3415_v2 = vadd.f32 %v2252_v62, %v3404_v52 }
 0x2fe   : > { %v3418_v3 = vadd.f32 %v2255_v1, %v3404_v52 }
 0x300   : > { %v1467_v4 = vpack.c.bf16 %v3418_v3, %v3415_v2  ;;  %v2256_v5 = vpop.f32.mrb[8].mxu1 }
 0x301   : > { %v2257_v7 = vpop.f32.mrb[9].mxu1 }
 0x302   : > { %v2258_v8 = vadd.f32 %v2257_v7, %v2256_v5  ;;  %v2259_v9 = vpop.f32.mrb[10].mxu1  ;;  %2341 = vmatmul.mubr.bf16.vlgmr.msra.gmra.mrb[32].mxu1 %v1467_v4  ;;  %v3463_v4 = vld [vmem:[%s3276_s23] sm:$0xff]  ;;  %v3466_v5 = vld [vmem:[%s3276_s23 + $0x8] sm:$0xff] }
 0x303   : > { %v2260_v10 = vpop.f32.mrb[11].mxu1  ;;  %2357 = vmatpush3.bf16.msra.mxu1 %v2678_v55 }
 0x304   : > { %v2261_v11 = vadd.f32 %v2260_v10, %v2259_v9  ;;  %2358 = vmatprep.subr.bf16.mxu1 %v2679_v6  ;;  %v3423_v13 = vadd.f32 %v2258_v8, %v3404_v52  ;;  %v1458_v8 = vpack.c.bf16 %v3466_v5, %v3463_v4  ;;  %v3479_v10 = vld [vmem:[%s3276_s23 + $0x10] sm:$0xff] }
 0x306   : > { %v3426_v14 = vadd.f32 %v2261_v11, %v3404_v52  ;;  %v3482_v11 = vld [vmem:[%s3276_s23 + $0x18] sm:$0xff] }
 0x307   : > { %2359 = vmatpush3.bf16.msra.mxu1 %v2679_v6 }
 0x308   : > { %v2262_v15 = vpop.f32.mrb[12].mxu1  ;;  %v1468_v16 = vpack.c.bf16 %v3426_v14, %v3423_v13  ;;  %2360 = vmatprep.subr.bf16.mxu1 %v2680_v12 }
 0x309   : > { %v2263_v18 = vpop.f32.mrb[13].mxu1 }
 0x30a   : > { %v2264_v19 = vadd.f32 %v2263_v18, %v2262_v15  ;;  %v2265_v20 = vpop.f32.mrb[14].mxu1  ;;  %2344 = vmatprep.mubr.bf16.mxu1 %v1468_v16  ;;  %v3490_v15 = vld [vmem:[%s3276_s23 + $0x28] sm:$0xff]  ;;  %v3498_v18 = vld [vmem:[%s3276_s23 + $0x38] sm:$0xff] }
 0x30b   : > { %v2266_v21 = vpop.f32.mrb[15].mxu1  ;;  %2361 = vmatpush3.bf16.msra.mxu1 %v2680_v12  ;;  %v1459_v12 = vpack.c.bf16 %v3482_v11, %v3479_v10 }
 0x30c   : > { %v2267_v22 = vadd.f32 %v2266_v21, %v2265_v20  ;;  %2362 = vmatprep.subr.bf16.mxu1 %v2681_v17  ;;  %v3431_v24 = vadd.f32 %v2264_v19, %v3404_v52  ;;  %v3501_v19 = vld [vmem:[%s3276_s23 + $0x40] sm:$0xff]  ;;  %v3504_v20 = vld [vmem:[%s3276_s23 + $0x48] sm:$0xff] }
 0x30e   : > { %v3434_v25 = vadd.f32 %v2267_v22, %v3404_v52  ;;  %v1462_v22 = vpack.c.bf16 %v3504_v20, %v3501_v19 }
 0x30f   : > { %2363 = vmatpush3.bf16.msra.mxu1 %v2681_v17  ;;  %v3495_v17 = vld [vmem:[%s3276_s23 + $0x30] sm:$0xff] }
 0x310   : > { %v2268_v26 = vpop.f32.mrb[16].mxu1  ;;  %v1469_v27 = vpack.c.bf16 %v3434_v25, %v3431_v24  ;;  %2364 = vmatprep.subr.bf16.mxu1 %v2682_v23  ;;  %v1461_v21 = vpack.c.bf16 %v3498_v18, %v3495_v17 }
 0x311   : > { %v2269_v29 = vpop.f32.mrb[17].mxu1 }
 0x312   : > { %v2270_v30 = vadd.f32 %v2269_v29, %v2268_v26  ;;  %v2271_v31 = vpop.f32.mrb[18].mxu1  ;;  %2345 = vmatmul.mubr.bf16.gmra.mrb[36].mxu1 %v1469_v27  ;;  %v3514_v26 = vld [vmem:[%s3276_s23 + $0x58] sm:$0xff]  ;;  %v3517_v27 = vld [vmem:[%s3276_s23 + $0x60] sm:$0xff] }
 0x313   : > { %v2272_v32 = vpop.f32.mrb[19].mxu1  ;;  %2365 = vmatpush3.bf16.msra.mxu1 %v2682_v23  ;;  %v3511_v23 = vld [vmem:[%s3276_s23 + $0x50] sm:$0xff] }
 0x314   : > { %v2273_v33 = vadd.f32 %v2272_v32, %v2271_v31  ;;  %2366 = vmatprep.subr.bf16.mxu1 %v2683_v28  ;;  %v3439_v35 = vadd.f32 %v2270_v30, %v3404_v52  ;;  %v1463_v29 = vpack.c.bf16 %v3514_v26, %v3511_v23  ;;  %v3527_v31 = vld [vmem:[%s3276_s23 + $0x70] sm:$0xff]  ;;  %v3530_v32 = vld [vmem:[%s3276_s23 + $0x78] sm:$0xff] }
 0x316   : > { %v3442_v36 = vadd.f32 %v2273_v33, %v3404_v52  ;;  %v1465_v33 = vpack.c.bf16 %v3530_v32, %v3527_v31 }
 0x317   : > { %2367 = vmatpush3.bf16.msra.mxu1 %v2683_v28  ;;  %v3520_v28 = vld [vmem:[%s3276_s23 + $0x68] sm:$0xff] }
 0x318   : > { %v2274_v37 = vpop.f32.mrb[20].mxu1  ;;  %v1470_v38 = vpack.c.bf16 %v3442_v36, %v3439_v35  ;;  %2368 = vmatprep.subr.bf16.mxu1 %v2684_v34  ;;  %v1464_v30 = vpack.c.bf16 %v3520_v28, %v3517_v27 }
 0x319   : > { %v2275_v40 = vpop.f32.mrb[21].mxu1 }
 0x31a   : > { %v2276_v41 = vadd.f32 %v2275_v40, %v2274_v37  ;;  %v2277_v42 = vpop.f32.mrb[22].mxu1  ;;  %2348 = vmatprep.mubr.bf16.mxu1 %v1470_v38 }
 0x31b   : > { %v2278_v43 = vpop.f32.mrb[23].mxu1  ;;  %2369 = vmatpush3.bf16.msra.mxu1 %v2684_v34  ;;  %v3537_v34 = vld [vmem:[%s3681_s7] ss:$0 sm:$0xff] }
 0x31c   : > { %v2279_v44 = vadd.f32 %v2278_v43, %v2277_v42  ;;  %2370 = vmatprep.subr.bf16.mxu1 %v2685_v39  ;;  %v3447_v45 = vadd.f32 %v2276_v41, %v3404_v52 }
 0x31e   : > { %v3450_v46 = vadd.f32 %v2279_v44, %v3404_v52 }
 0x31f   : > { %2371 = vmatpush3.bf16.msra.mxu1 %v2685_v39 }
 0x320   : > { %v2280_v47 = vpop.f32.mrb[24].mxu1  ;;  %v1471_v54 = vpack.c.bf16 %v3450_v46, %v3447_v45 }
 0x321   : > { %v2281_v55 = vpop.f32.mrb[25].mxu1 }
 0x322   : > { %v2282_v48 = vadd.f32 %v2281_v55, %v2280_v47  ;;  %v2283_v49 = vpop.f32.mrb[26].mxu1  ;;  %2349 = vmatmul.mubr.bf16.gmra.mrb[40].mxu1 %v1471_v54 }
 0x323   : > { %v2284_v50 = vpop.f32.mrb[27].mxu1 }
 0x324   : > { %v2285_v51 = vadd.f32 %v2284_v50, %v2283_v49  ;;  %v3455_v53 = vadd.f32 %v2282_v48, %v3404_v52 }
 0x326   : > { %v3458_v56 = vadd.f32 %v2285_v51, %v3404_v52 }
 0x328   : > { %v2286_v59 = vpop.f32.mrb[28].mxu1  ;;  %v1472_v60 = vpack.c.bf16 %v3458_v56, %v3455_v53 }
 0x329   : > { %v2287_v61 = vpop.f32.mrb[29].mxu1 }
 0x32a   : > { %v2288_v62 = vadd.f32 %v2287_v61, %v2286_v59  ;;  %v2289_v63 = vpop.f32.mrb[30].mxu1  ;;  %2352 = vmatprep.mubr.bf16.mxu1 %v1472_v60 }
 0x32b   : > { %v2290_v0 = vpop.f32.mrb[31].mxu1 }
 0x32c   : > { %v2291_v1 = vadd.f32 %v2290_v0, %v2289_v63  ;;  %v3469_v6 = vadd.f32 %v2288_v62, %v3404_v52 }
 0x32e   : > { %v3472_v7 = vadd.f32 %v2291_v1, %v3404_v52  ;;  %v3487_v52 = vld [vmem:[%s3276_s23 + $0x20] sm:$0xff]  ;;  %s2985_s23 = smov [#allocation11]  }
 0x32f   : > { %v1460_v16 = vpack.c.bf16 %v3490_v15, %v3487_v52  ;;  %s2898_s4 = sshll.u32 %s2985_s23, 4  ;;  %s2899_s4 = int_to_ptr.vmem [resolvable:$false] %s2898_s4 }
 0x330   : > { %v1473_v9 = vpack.c.bf16 %v3472_v7, %v3469_v6  ;;  %s2900_s13 = scalar_lea.vmem %s2899_s4, 4096  ;;  %p2901_p8 = scmp.lt.s32.totalorder %s3626_s21, %s2899_s4 }
 0x331   : > { %p2902_p6 = scmp.lt.s32.totalorder %s2900_s13, %s2894_s20 }
 0x332   : > { %2353 = vmatmul.mubr.bf16.gmra.mrb[44].mxu1 %v1473_v9 }
 0x333   : > { %2372 = vmatprep.mubr.bf16.mxu1 %v1458_v8  ;;  %p2903_p10 = por %p2902_p6, %p2901_p8 }
 0x335   : > { %p2904_p3 = pnand %p2903_p10, %p2897_p0 }
 0x33a   : > { %2373 = vmatmul.mubr.bf16.vlgmr.msra.gmra.mrb[32].mxu1 %v1459_v12 }
 0x33b   : > { %2376 = vmatprep.mubr.bf16.mxu1 %v1460_v16 }
 0x342   : > { %2377 = vmatmul.mubr.bf16.gmra.mrb[36].mxu1 %v1461_v21 }
 0x343   : > { %2380 = vmatprep.mubr.bf16.mxu1 %v1462_v22 }
 0x34a   : > { %2381 = vmatmul.mubr.bf16.gmra.mrb[40].mxu1 %v1463_v29 }
 0x34b   : > { %2384 = vmatprep.mubr.bf16.mxu1 %v1464_v30 }
 0x352   : > { %2385 = vmatmul.mubr.bf16.gmra.mrb[44].mxu1 %v1465_v33 }
 0x40d   : > { %v2374_v37 = vpop.f32.mrb[32].mxu1 }
 0x40e   : > { %v1773_v38 = vadd.f32 %v2374_v37, %v3537_v34  ;;  %v1701_v39 = vpop.f32.mrb[33].mxu1 }
 0x40f   : > { %v1771_v40 = vadd.f32 %v3537_v34, %v1701_v39  ;;  %v2375_v41 = vpop.f32.mrb[34].mxu1 }
 0x410   : > { %v2205_v42 = vmul.f32 -1.442695, %v1773_v38  ;;  %v1774_v43 = vadd.f32 %v2375_v41, %v3537_v34  ;;  %v1704_v44 = vpop.f32.mrb[35].mxu1 }
 0x411   : > { %v2203_v47 = vmul.f32 -1.442695, %v1771_v40  ;;  %v1772_v54 = vadd.f32 %v3537_v34, %v1704_v44 }
 0x412   : > { %2686 = vpow2.f32 %v2205_v42  ;;  %v2206_v55 = vmul.f32 -1.442695, %v1774_v43 }
 0x413   : > { %2688 = vpow2.f32 %v2203_v47  ;;  %v2204_v48 = vmul.f32 -1.442695, %v1772_v54 }
 0x414   : > { %2690 = vpow2.f32 %v2206_v55 }
 0x415   : > { %2692 = vpow2.f32 %v2204_v48  ;;  %v2378_v49 = vpop.f32.mrb[36].mxu1 }
 0x416   : > { %v1777_v50 = vadd.f32 %v2378_v49, %v3537_v34  ;;  %v1717_v51 = vpop.f32.mrb[37].mxu1 }
 0x417   : > { %v1775_v59 = vadd.f32 %v3537_v34, %v1717_v51  ;;  %v2379_v60 = vpop.f32.mrb[38].mxu1 }
 0x418   : > { %v2209_v61 = vmul.f32 -1.442695, %v1777_v50  ;;  %v1778_v62 = vadd.f32 %v2379_v60, %v3537_v34  ;;  %v1720_v63 = vpop.f32.mrb[39].mxu1 }
 0x419   : > { %v2207_v0 = vmul.f32 -1.442695, %v1775_v59  ;;  %v1776_v1 = vadd.f32 %v3537_v34, %v1720_v63 }
 0x41a   : > { %2694 = vpow2.f32 %v2209_v61  ;;  %v2210_v8 = vmul.f32 -1.442695, %v1778_v62 }
 0x41b   : > { %2696 = vpow2.f32 %v2207_v0  ;;  %v2208_v9 = vmul.f32 -1.442695, %v1776_v1 }
 0x41c   : > { %v2687_v12 = vpop.eup %2686  ;;  %2698 = vpow2.f32 %v2210_v8  ;;  %v1885_v8 = vsub.f32 %v3415_v2, %v3479_v10 }
 0x41d   : > { %v2689_v16 = vpop.eup %2688  ;;  %v1837_v21 = vadd.f32 1.0, %v2687_v12  ;;  %2700 = vpow2.f32 %v2208_v9  ;;  %v2382_v22 = vpop.f32.mrb[40].mxu1 }
 0x41e   : > { %v2691_v29 = vpop.eup %2690  ;;  %v1835_v30 = vadd.f32 1.0, %v2689_v16  ;;  %v1781_v33 = vadd.f32 %v2382_v22, %v3537_v34  ;;  %v1733_v37 = vpop.f32.mrb[41].mxu1 }
 0x41f   : > { %v2693_v38 = vpop.eup %2692  ;;  %2702 = vrcp.f32 %v1837_v21  ;;  %v1838_v39 = vadd.f32 1.0, %v2691_v29  ;;  %v1779_v40 = vadd.f32 %v3537_v34, %v1733_v37  ;;  %v2383_v41 = vpop.f32.mrb[42].mxu1  ;;  %v1883_v37 = vsub.f32 %v3407_v57, %v3463_v4 }
 0x420   : > { %2704 = vrcp.f32 %v1835_v30  ;;  %v1836_v42 = vadd.f32 1.0, %v2693_v38  ;;  %v2213_v43 = vmul.f32 -1.442695, %v1781_v33  ;;  %v1782_v44 = vadd.f32 %v2383_v41, %v3537_v34  ;;  %v1736_v47 = vpop.f32.mrb[43].mxu1 }
 0x421   : > { %2706 = vrcp.f32 %v1838_v39  ;;  %v2211_v54 = vmul.f32 -1.442695, %v1779_v40  ;;  %v1780_v55 = vadd.f32 %v3537_v34, %v1736_v47  ;;  %v1886_v40 = vsub.f32 %v3418_v3, %v3482_v11 }
 0x422   : > { %2708 = vrcp.f32 %v1836_v42  ;;  %v2214_v48 = vmul.f32 -1.442695, %v1782_v44  ;;  %v1884_v44 = vsub.f32 %v3410_v58, %v3466_v5 }
 0x423   : > { %2710 = vpow2.f32 %v2213_v43  ;;  %v2212_v49 = vmul.f32 -1.442695, %v1780_v55 }
 0x424   : > { %v2695_v50 = vpop.eup %2694  ;;  %2712 = vpow2.f32 %v2211_v54 }
 0x425   : > { %v2697_v51 = vpop.eup %2696  ;;  %v1841_v59 = vadd.f32 1.0, %v2695_v50  ;;  %2714 = vpow2.f32 %v2214_v48  ;;  %v2386_v60 = vpop.f32.mrb[44].mxu1 }
 0x426   : > { %v2699_v61 = vpop.eup %2698  ;;  %v1839_v62 = vadd.f32 1.0, %v2697_v51  ;;  %2716 = vpow2.f32 %v2212_v49  ;;  %v1785_v63 = vadd.f32 %v2386_v60, %v3537_v34  ;;  %v1749_v0 = vpop.f32.mrb[45].mxu1 }
 0x427   : > { %v2701_v1 = vpop.eup %2700  ;;  %2718 = vrcp.f32 %v1841_v59  ;;  %v1842_v9 = vadd.f32 1.0, %v2699_v61  ;;  %v1783_v12 = vadd.f32 %v3537_v34, %v1749_v0  ;;  %v2387_v16 = vpop.f32.mrb[46].mxu1  ;;  %v1889_v61 = vsub.f32 %v3431_v24, %v3495_v17 }
 0x428   : > { %2720 = vrcp.f32 %v1839_v62  ;;  %v1840_v21 = vadd.f32 1.0, %v2701_v1  ;;  %v2217_v22 = vmul.f32 -1.442695, %v1785_v63  ;;  %v1786_v29 = vadd.f32 %v2387_v16, %v3537_v34  ;;  %v1752_v30 = vpop.f32.mrb[47].mxu1 }
 0x429   : > { %v2703_v33 = vpop.eup %2702  ;;  %2722 = vrcp.f32 %v1842_v9  ;;  %v2215_v38 = vmul.f32 -1.442695, %v1783_v12  ;;  %v1784_v39 = vadd.f32 %v3537_v34, %v1752_v30  ;;  %v1887_v0 = vsub.f32 %v3423_v13, %v3487_v52 }
 0x42a   : > { %v2705_v2 = vpop.eup %2704  ;;  %v1901_v41 = vmul.f32 %v2703_v33, %v1885_v8  ;;  %2724 = vrcp.f32 %v1840_v21  ;;  %v2218_v42 = vmul.f32 -1.442695, %v1786_v29  ;;  %v1888_v24 = vsub.f32 %v3426_v14, %v3490_v15 }
 0x42b   : > { %v2707_v43 = vpop.eup %2706  ;;  %v1899_v47 = vmul.f32 %v2705_v2, %v1883_v37  ;;  %2726 = vpow2.f32 %v2217_v22  ;;  %v2216_v54 = vmul.f32 -1.442695, %v1784_v39 }
 0x42c   : > { %v2709_v57 = vpop.eup %2708  ;;  %v1917_v55 = vadd.f32 %v1901_v41, %v3479_v10  ;;  %v1902_v48 = vmul.f32 %v2707_v43, %v1886_v40  ;;  %2728 = vpow2.f32 %v2215_v38  ;;  %v1893_v40 = vsub.f32 %v3447_v45, %v3511_v23 }
 0x42d   : > { %v2711_v34 = vpop.eup %2710  ;;  %v1915_v49 = vadd.f32 %v1899_v47, %v3463_v4  ;;  %v1900_v3 = vmul.f32 %v2709_v57, %v1884_v44  ;;  %2730 = vpow2.f32 %v2218_v42  ;;  %v1892_v45 = vsub.f32 %v3442_v36, %v3504_v20 }
 0x42e   : > { %v2713_v50 = vpop.eup %2712  ;;  %1933 = vst [vmem:[%s3567_s19 + $0x10] sm:$0xff] %v1917_v55  ;;  %v1918_v58 = vadd.f32 %v1902_v48, %v3482_v11  ;;  %v1845_v51 = vadd.f32 1.0, %v2711_v34  ;;  %2732 = vpow2.f32 %v2216_v54 }
 0x42f   : > { %v2715_v10 = vpop.eup %2714  ;;  %1931 = vst [vmem:[%s3567_s19] sm:$0xff] %v1915_v49  ;;  %v1916_v59 = vadd.f32 %v1900_v3, %v3466_v5  ;;  %v1843_v4 = vadd.f32 1.0, %v2713_v50  ;;  %v1890_v5 = vsub.f32 %v3434_v25, %v3498_v18  ;;  %v1897_v49 = vsub.f32 %v3469_v6, %v3527_v31 }
 0x430   : > { %v2717_v60 = vpop.eup %2716  ;;  %1934 = vst [vmem:[%s3567_s19 + $0x18] sm:$0xff] %v1918_v58  ;;  %2734 = vrcp.f32 %v1845_v51  ;;  %v1846_v62 = vadd.f32 1.0, %v2715_v10  ;;  %v1898_v3 = vsub.f32 %v3472_v7, %v3530_v32 }
 0x431   : > { %v2719_v63 = vpop.eup %2718  ;;  %1932 = vst [vmem:[%s3567_s19 + $0x8] sm:$0xff] %v1916_v59  ;;  %2736 = vrcp.f32 %v1843_v4  ;;  %v1844_v11 = vadd.f32 1.0, %v2717_v60 }
 0x432   : > { %v2721_v1 = vpop.eup %2720  ;;  %v1905_v8 = vmul.f32 %v2719_v63, %v1889_v61  ;;  %2738 = vrcp.f32 %v1846_v62 }
 0x433   : > { %v2723_v9 = vpop.eup %2722  ;;  %v1903_v12 = vmul.f32 %v2721_v1, %v1887_v0  ;;  %2740 = vrcp.f32 %v1844_v11 }
 0x434   : > { %v2725_v16 = vpop.eup %2724  ;;  %v1921_v13 = vadd.f32 %v1905_v8, %v3495_v17  ;;  %v1906_v21 = vmul.f32 %v2723_v9, %v1890_v5 }
 0x435   : > { %v2727_v22 = vpop.eup %2726  ;;  %v1919_v29 = vadd.f32 %v1903_v12, %v3487_v52  ;;  %v1904_v30 = vmul.f32 %v2725_v16, %v1888_v24 }
 0x436   : > { %v2729_v25 = vpop.eup %2728  ;;  %1937 = vst [vmem:[%s3567_s19 + $0x30] sm:$0xff] %v1921_v13  ;;  %v1922_v33 = vadd.f32 %v1906_v21, %v3498_v18  ;;  %v1849_v37 = vadd.f32 1.0, %v2727_v22  ;;  %v1891_v18 = vsub.f32 %v3439_v35, %v3501_v19 }
 0x437   : > { %v2731_v38 = vpop.eup %2730  ;;  %1935 = vst [vmem:[%s3567_s19 + $0x20] sm:$0xff] %v1919_v29  ;;  %v1920_v14 = vadd.f32 %v1904_v30, %v3490_v15  ;;  %v1847_v39 = vadd.f32 1.0, %v2729_v25  ;;  %v1894_v15 = vsub.f32 %v3450_v46, %v3514_v26 }
 0x438   : > { %v2733_v2 = vpop.eup %2732  ;;  %1938 = vst [vmem:[%s3567_s19 + $0x38] sm:$0xff] %v1922_v33  ;;  %2742 = vrcp.f32 %v1849_v37  ;;  %v1850_v17 = vadd.f32 1.0, %v2731_v38 }
 0x439   : > { %1936 = vst [vmem:[%s3567_s19 + $0x28] sm:$0xff] %v1920_v14  ;;  %2744 = vrcp.f32 %v1847_v39  ;;  %v1848_v52 = vadd.f32 1.0, %v2733_v2 }
 0x43a   : > { %v2735_v41 = vpop.eup %2734  ;;  %2746 = vrcp.f32 %v1850_v17 }
 0x43b   : > { %v2737_v42 = vpop.eup %2736  ;;  %v1909_v43 = vmul.f32 %v2735_v41, %v1893_v40  ;;  %2748 = vrcp.f32 %v1848_v52 }
 0x43c   : > { %v2739_v44 = vpop.eup %2738  ;;  %v1907_v47 = vmul.f32 %v2737_v42, %v1891_v18 }
 0x43d   : > { %v2741_v54 = vpop.eup %2740  ;;  %v1925_v57 = vadd.f32 %v1909_v43, %v3511_v23  ;;  %v1910_v55 = vmul.f32 %v2739_v44, %v1894_v15  ;;  %v1895_v23 = vsub.f32 %v3455_v53, %v3517_v27 }
 0x43e   : > { %v1923_v35 = vadd.f32 %v1907_v47, %v3501_v19  ;;  %v1908_v48 = vmul.f32 %v2741_v54, %v1892_v45 }
 0x43f   : > { %1941 = vst [vmem:[%s3567_s19 + $0x50] sm:$0xff] %v1925_v57  ;;  %v1926_v46 = vadd.f32 %v1910_v55, %v3514_v26 }
 0x440   : > { %1939 = vst [vmem:[%s3567_s19 + $0x40] sm:$0xff] %v1923_v35  ;;  %v1924_v34 = vadd.f32 %v1908_v48, %v3504_v20  ;;  %v1896_v20 = vsub.f32 %v3458_v56, %v3520_v28 }
 0x441   : > { %1942 = vst [vmem:[%s3567_s19 + $0x58] sm:$0xff] %v1926_v46 }
 0x442   : > { %v2743_v36 = vpop.eup %2742  ;;  %1940 = vst [vmem:[%s3567_s19 + $0x48] sm:$0xff] %v1924_v34 }
 0x443   : > { %v2745_v19 = vpop.eup %2744  ;;  %v1913_v50 = vmul.f32 %v2743_v36, %v1897_v49 }
 0x444   : > { %v2747_v26 = vpop.eup %2746  ;;  %v1911_v6 = vmul.f32 %v2745_v19, %v1895_v23 }
 0x445   : > { %v2749_v58 = vpop.eup %2748  ;;  %v1929_v53 = vadd.f32 %v1913_v50, %v3527_v31  ;;  %v1914_v51 = vmul.f32 %v2747_v26, %v1898_v3 }
 0x446   : > { %v1927_v10 = vadd.f32 %v1911_v6, %v3517_v27  ;;  %v1912_v7 = vmul.f32 %v2749_v58, %v1896_v20 }
 0x447   : > { %1945 = vst [vmem:[%s3567_s19 + $0x70] sm:$0xff] %v1929_v53  ;;  %v1930_v59 = vadd.f32 %v1914_v51, %v3530_v32 }
 0x448   : > { %1943 = vst [vmem:[%s3567_s19 + $0x60] sm:$0xff] %v1927_v10  ;;  %v1928_v56 = vadd.f32 %v1912_v7, %v3520_v28 }
 0x449   : > { %1946 = vst [vmem:[%s3567_s19 + $0x78] sm:$0xff] %v1930_v59 }
 0x44a   : > { %1944 = vst [vmem:[%s3567_s19 + $0x68] sm:$0xff] %v1928_v56 }
 0x44b   : > { %2907 = shalt.err (!%p2904_p3)
}
 0x44c   : > { %s2908_s15 = scalar_lea.hbm %s3624_s27, 2048  ;;  %s2912_s2 = scalar_lea.hbm %s3682_s8, 4096 }
 0x44d   : > { %p2909_p9 = scmp.ne.s32.totalorder %s3624_s27, %s2908_s15  ;;  %p2913_p7 = scmp.lt.u32.totalorder %s3624_s27, %s3682_s8 }
 0x44e   : > { %p2914_p12 = scmp.lt.u32.totalorder %s2912_s2, %s2908_s15  ;;  %p2916_p2 = scmp.lt.u32.totalorder %s2908_s15, %s3624_s27 }
 0x44f   : > { %p2910_p13 = pnand %p2909_p9, %p3178_p5 }
 0x450   : > { %p2915_p1 = por %p2914_p12, %p2913_p7 }
 0x451   : > { %p2911_p11 = pneg %p2910_p13 }
 0x452   : > { %p2917_p4 = por %p2916_p2, %p2915_p1 }
 0x454   : > { %p2918_p0 = pnand %p2917_p4, %p2911_p11 }
 0x456   : > { %2921 = shalt.err (!%p2918_p0)
}
 0x457   : > { %s2986_s17 = smov 128   ;;  %s2987_s0 = smov 8  }
 0x458   : > { %2484 = dma.vmem_to_hbm [thread:$0]  (%p3178_p5), %s3626_s21, 2048, %s3624_s27, %s1948_s9, %s2986_s17, %s2986_s17, %s2987_s0  }
 0x459 PF: > { %s3717_s19 = sld [smem:[#allocation17_spill]]  ;;  %s3718_s12 = sld [smem:[#allocation18_spill]] }
 0x45a   : > { %p3720_p6 = scmp.ge.s32.totalorder %s2972_s30, 2 }
 0x45f   : > { %s1976_s6 = sand.u32 1, %s3717_s19   ;;  %p3719_p8 = scmp.ne.s32.totalorder %s3718_s12, 0 }
 0x460   : > { %s1977_s22 = scalar_lea.sflag [#allocation4], %s1976_s6 }
 0x461   : > { %p2504_p10 = pnand %p3720_p6, %p3719_p8 }
 0x463   : > { %2955 = dma.done.wait (!%p2504_p10), %s1977_s22, 2048  }
 0x464   : > { %2957 = vsyncadd (!%p2504_p10), %s1977_s22, 4294965248  ;;  %p25_p3 = scmp.ge.s32.totalorder %s3146_s25, 4   ;;  %s3721_s27 = smov %s2964_s28 }
 0x465   : > { %s3722_s28 = smov %s2968_s29  ;;  %s3723_s29 = smov %s3174_s16 }
 0x466   : > { %s3724_s30 = smov %s3146_s25  ;;  %27 = sbr.rel (!%p25_p3) target bundleno = 13 (0xd), region = 122 }
 0x46d   :  { %1982 = vsyncpa [#allocation3], 1 }
 0x46e   :  { %1984 = vsyncpa [#allocation3 + $0x1], 1 }
 0x46f   :  { %1985 = vsyncpa [#allocation6], 1 }
 0x470   :  { %1987 = vsyncpa [#allocation6 + $0x1], 1 }
 0x471   :  { %1988 = vsyncpa [#allocation9], 1 }
 0x472   :  { %1989 = vsyncpa [#allocation4], 1 }
 0x473   :  { %1991 = vsyncpa [#allocation4 + $0x1], 1 }

</bundles_post_ra>
